<compile_context>
chip_gen: v7x
topology: tpu7x:2x2x1
jax: 0.10.0
libtpu: 0.0.40
codegen_flags: <defaults>
</compile_context>

<pallas_src>
import jax
import jax.numpy as jnp
from jax.experimental import pallas as pl
from jax.experimental.pallas import tpu as pltpu


def _mlp_kernel(e1_ref, e2_ref, w1a_ref, w1b_ref, b1_ref, w2_ref, b2_ref,
                w3_ref, b3_ref, o_ref):
    # ---- layer 1: split matmul replaces concat(e1, e2) @ W1 ----
    e1 = e1_ref[...].astype(jnp.bfloat16)                        # (TB, D)
    e2 = e2_ref[...].astype(jnp.bfloat16)                        # (TB, D)
    h1 = jnp.dot(e1, w1a_ref[...], preferred_element_type=jnp.float32)
    h1 = h1 + jnp.dot(e2, w1b_ref[...], preferred_element_type=jnp.float32)
    h1 = jnp.maximum(h1 + b1_ref[...], 0.0)                      # (TB, H) f32

    # ---- layer 2 ----
    h2 = jnp.dot(h1.astype(jnp.bfloat16), w2_ref[...],
                 preferred_element_type=jnp.float32)
    h2 = jnp.maximum(h2 + b2_ref[...], 0.0)                      # (TB, H2) f32

    # ---- layer 3 (out features = 1): VPU multiply + lane reduce, not MXU ----
    score = jnp.sum(h2 * w3_ref[...], axis=-1, keepdims=True) + b3_ref[...]
    o_ref[...] = score.astype(o_ref.dtype)                       # (TB, 1)


def _vmem_limit_bytes(tile_b, D, H, H2):
    x_io = 2 * 2 * tile_b * D * 4                  # e1 + e2 tiles, f32, 2-buffered
    out_io = 2 * tile_b * 1 * 4                    # (TB, 1) f32 output, 2-buffered
    weights = (2 * D * H + H * H2) * 2             # bf16 W1a, W1b, W2 (resident once)
    biases = (H + H2 + H2 + 1) * 4                 # b1, b2, w3, b3 (f32)
    acts = tile_b * (2 * D * 2 + H * 4 + H * 2 + H2 * 4)   # bf16 casts + h1/h2 temps
    est = x_io + out_io + weights + biases + acts
    return max(int(est) + (8 << 20), 32 << 20)     # never below the 32 MiB default


def embedding2score_v2(embedding1, embedding2, params, *, tile_b=256):
    """embedding1 / embedding2: [B, D] float32.  Returns [B, 1] float32."""
    w1a, w1b, b1, w2, b2, w3, b3 = params
    B, D = embedding1.shape
    H = w1a.shape[1]
    H2 = w2.shape[1]

    # Keep the batch tile a multiple of 8 sublanes and no larger than needed.
    tile_b = max(8, min(tile_b, ((B + 7) // 8) * 8))
    n_tiles = pl.cdiv(B, tile_b)

    # Grid-invariant operands: one resident VMEM copy, no per-step re-DMA.
    vmem_whole = pl.BlockSpec(memory_space=pltpu.MemorySpace.VMEM)

    out = pl.pallas_call(
        _mlp_kernel,
        out_shape=jax.ShapeDtypeStruct((B, 1), jnp.float32),
        grid=(n_tiles,),
        in_specs=[
            pl.BlockSpec((tile_b, D), lambda i: (i, 0)),   # e1 tile
            pl.BlockSpec((tile_b, D), lambda i: (i, 0)),   # e2 tile
            vmem_whole,                                    # W1a  (D, H)  bf16
            vmem_whole,                                    # W1b  (D, H)  bf16
            vmem_whole,                                    # b1   (1, H)  f32
            vmem_whole,                                    # W2   (H, H2) bf16
            vmem_whole,                                    # b2   (1, H2) f32
            vmem_whole,                                    # w3   (1, H2) f32
            vmem_whole,                                    # b3   (1, 1)  f32
        ],
        out_specs=pl.BlockSpec((tile_b, 1), lambda i: (i, 0)),
        compiler_params=pltpu.CompilerParams(
            dimension_semantics=("parallel",),
            vmem_limit_bytes=_vmem_limit_bytes(tile_b, D, H, H2),
        ),
    )(embedding1, embedding2, w1a, w1b, b1, w2, b2, w3, b3)
    return out


def init_params(key, input_dim, hidden_dim):
    """Deterministic synthetic parameters (shapes follow the torch module)."""
    k1, k1b, k2, k3, k4, k5, k6 = jax.random.split(key, 7)
    d, h, h2 = input_dim, hidden_dim, hidden_dim // 2
    # fc1 weight [in=2D, out=H] split into the e1 half and the e2 half.
    w1a = (jax.random.normal(k1, (d, h), jnp.float32) * 0.02).astype(jnp.bfloat16)
    w1b = (jax.random.normal(k1b, (d, h), jnp.float32) * 0.02).astype(jnp.bfloat16)
    b1 = jax.random.normal(k2, (1, h), jnp.float32) * 0.02
    w2 = (jax.random.normal(k3, (h, h2), jnp.float32) * 0.02).astype(jnp.bfloat16)
    b2 = jax.random.normal(k4, (1, h2), jnp.float32) * 0.02
    w3 = jax.random.normal(k5, (1, h2), jnp.float32) * 0.02   # fc3 weight as a row
    b3 = jax.random.normal(k6, (1, 1), jnp.float32) * 0.02
    return (w1a, w1b, b1, w2, b2, w3, b3)


def reference(embedding1, embedding2, params):
    """Precision-matched reference (bf16 weights, f32 accumulation)."""
    w1a, w1b, b1, w2, b2, w3, b3 = params
    h1 = (jnp.dot(embedding1.astype(jnp.bfloat16), w1a,
                  preferred_element_type=jnp.float32)
          + jnp.dot(embedding2.astype(jnp.bfloat16), w1b,
                    preferred_element_type=jnp.float32) + b1)
    h1 = jnp.maximum(h1, 0.0)
    h2 = jnp.maximum(
        jnp.dot(h1.astype(jnp.bfloat16), w2,
                preferred_element_type=jnp.float32) + b2, 0.0)
    return jnp.sum(h2 * w3, axis=-1, keepdims=True) + b3


if __name__ == "__main__":
    # Small shapes consistent with the module (input_dim=4096, hidden_dim=1024
    # scaled down).  B is deliberately NOT a multiple of tile_b to exercise the
    # ragged-last-block handling (grid of 2 tiles: 256 rows + 128 rows).
    B = 384
    input_dim = 256    # per-embedding dim (torch default 4096, scaled down)
    hidden_dim = 128   # hidden dim (fc2 out = 64)

    key = jax.random.PRNGKey(0)
    ke1, ke2, kp = jax.random.split(key, 3)
    e1 = jax.random.normal(ke1, (B, input_dim), jnp.float32)
    e2 = jax.random.normal(ke2, (B, input_dim), jnp.float32)
    params = init_params(kp, input_dim, hidden_dim)

    score = embedding2score_v2(e1, e2, params, tile_b=256)
    score = jax.block_until_ready(score)

    ref = reference(e1, e2, params)
    assert score.shape == (B, 1)
    assert jnp.allclose(score, ref, atol=1e-3, rtol=1e-3), "mismatch vs reference"

    print("KERNEL_OK")
</pallas_src>

<mosaic_0001>
module attributes {stable_mosaic.version = 11 : i64} {
  func.func @_mlp_kernel(%arg0: i32, %arg1: memref<256x256xf32, #tpu.memory_space<vmem>>, %arg2: memref<256x256xf32, #tpu.memory_space<vmem>>, %arg3: memref<256x128xbf16, #tpu.memory_space<vmem>>, %arg4: memref<256x128xbf16, #tpu.memory_space<vmem>>, %arg5: memref<1x128xf32, #tpu.memory_space<vmem>>, %arg6: memref<128x64xbf16, #tpu.memory_space<vmem>>, %arg7: memref<1x64xf32, #tpu.memory_space<vmem>>, %arg8: memref<1x64xf32, #tpu.memory_space<vmem>>, %arg9: memref<1x1xf32, #tpu.memory_space<vmem>>, %arg10: memref<256x1xf32, #tpu.memory_space<vmem>>) attributes {dimension_semantics = [#tpu.dimension_semantics<parallel>], iteration_bounds = array<i64: 2>, scalar_prefetch = 0 : i64, scratch_operands = 0 : i64, tpu.core_type = #tpu.core_type<tc>, window_params = [{transform_indices = @transform_0, window_bounds = array<i64: 256, 256>}, {transform_indices = @transform_1, window_bounds = array<i64: 256, 256>}, {pipeline_mode = #tpu.pipeline_mode<synchronous>, transform_indices = @transform_2, window_bounds = array<i64: 256, 128>}, {pipeline_mode = #tpu.pipeline_mode<synchronous>, transform_indices = @transform_3, window_bounds = array<i64: 256, 128>}, {pipeline_mode = #tpu.pipeline_mode<synchronous>, transform_indices = @transform_4, window_bounds = array<i64: 1, 128>}, {pipeline_mode = #tpu.pipeline_mode<synchronous>, transform_indices = @transform_5, window_bounds = array<i64: 128, 64>}, {pipeline_mode = #tpu.pipeline_mode<synchronous>, transform_indices = @transform_6, window_bounds = array<i64: 1, 64>}, {pipeline_mode = #tpu.pipeline_mode<synchronous>, transform_indices = @transform_7, window_bounds = array<i64: 1, 64>}, {pipeline_mode = #tpu.pipeline_mode<synchronous>, transform_indices = @transform_8, window_bounds = array<i64: 1, 1>}, {transform_indices = @transform_9, window_bounds = array<i64: 256, 1>}]} {
    %c0 = arith.constant 0 : index
    %c0_0 = arith.constant 0 : index
    %0 = vector.load %arg1[%c0, %c0_0] : memref<256x256xf32, #tpu.memory_space<vmem>>, vector<256x256xf32>
    %1 = arith.truncf %0 : vector<256x256xf32> to vector<256x256xbf16>
    %c0_1 = arith.constant 0 : index
    %c0_2 = arith.constant 0 : index
    %2 = vector.load %arg2[%c0_1, %c0_2] : memref<256x256xf32, #tpu.memory_space<vmem>>, vector<256x256xf32>
    %3 = arith.truncf %2 : vector<256x256xf32> to vector<256x256xbf16>
    %c0_3 = arith.constant 0 : index
    %c0_4 = arith.constant 0 : index
    %4 = vector.load %arg3[%c0_3, %c0_4] : memref<256x128xbf16, #tpu.memory_space<vmem>>, vector<256x128xbf16>
    %cst = arith.constant dense<0.000000e+00> : vector<256x128xf32>
    %5 = tpu.matmul %1, %4, %cst {dimension_numbers = #tpu.dot_dimension_numbers<[1], [0], [0], [1], [0, 0, 1, 1], [], []>} : vector<256x256xbf16>, vector<256x128xbf16>, vector<256x128xf32> -> vector<256x128xf32>
    %c0_5 = arith.constant 0 : index
    %c0_6 = arith.constant 0 : index
    %6 = vector.load %arg4[%c0_5, %c0_6] : memref<256x128xbf16, #tpu.memory_space<vmem>>, vector<256x128xbf16>
    %cst_7 = arith.constant dense<0.000000e+00> : vector<256x128xf32>
    %7 = tpu.matmul %3, %6, %cst_7 {dimension_numbers = #tpu.dot_dimension_numbers<[1], [0], [0], [1], [0, 0, 1, 1], [], []>} : vector<256x256xbf16>, vector<256x128xbf16>, vector<256x128xf32> -> vector<256x128xf32>
    %8 = arith.addf %5, %7 : vector<256x128xf32>
    %c0_8 = arith.constant 0 : index
    %c0_9 = arith.constant 0 : index
    %9 = vector.load %arg5[%c0_8, %c0_9] : memref<1x128xf32, #tpu.memory_space<vmem>>, vector<1x128xf32>
    %10 = vector.broadcast %9 : vector<1x128xf32> to vector<256x128xf32>
    %11 = arith.addf %8, %10 : vector<256x128xf32>
    %cst_10 = arith.constant 0.000000e+00 : f32
    %12 = vector.broadcast %cst_10 : f32 to vector<256x128xf32>
    %13 = arith.maximumf %11, %12 : vector<256x128xf32>
    %14 = arith.truncf %13 : vector<256x128xf32> to vector<256x128xbf16>
    %c0_11 = arith.constant 0 : index
    %c0_12 = arith.constant 0 : index
    %15 = vector.load %arg6[%c0_11, %c0_12] : memref<128x64xbf16, #tpu.memory_space<vmem>>, vector<128x64xbf16>
    %cst_13 = arith.constant dense<0.000000e+00> : vector<256x64xf32>
    %16 = tpu.matmul %14, %15, %cst_13 {dimension_numbers = #tpu.dot_dimension_numbers<[1], [0], [0], [1], [0, 0, 1, 1], [], []>} : vector<256x128xbf16>, vector<128x64xbf16>, vector<256x64xf32> -> vector<256x64xf32>
    %c0_14 = arith.constant 0 : index
    %c0_15 = arith.constant 0 : index
    %17 = vector.load %arg7[%c0_14, %c0_15] : memref<1x64xf32, #tpu.memory_space<vmem>>, vector<1x64xf32>
    %18 = vector.broadcast %17 : vector<1x64xf32> to vector<256x64xf32>
    %19 = arith.addf %16, %18 : vector<256x64xf32>
    %cst_16 = arith.constant 0.000000e+00 : f32
    %20 = vector.broadcast %cst_16 : f32 to vector<256x64xf32>
    %21 = arith.maximumf %19, %20 : vector<256x64xf32>
    %c0_17 = arith.constant 0 : index
    %c0_18 = arith.constant 0 : index
    %22 = vector.load %arg8[%c0_17, %c0_18] : memref<1x64xf32, #tpu.memory_space<vmem>>, vector<1x64xf32>
    %23 = vector.broadcast %22 : vector<1x64xf32> to vector<256x64xf32>
    %24 = arith.mulf %21, %23 : vector<256x64xf32>
    %cst_19 = arith.constant dense<0.000000e+00> : vector<256xf32>
    %25 = vector.multi_reduction <add>, %24, %cst_19 [1] : vector<256x64xf32> to vector<256xf32>
    %26 = vector.shape_cast %25 : vector<256xf32> to vector<256x1xf32>
    %c0_20 = arith.constant 0 : index
    %c0_21 = arith.constant 0 : index
    %27 = vector.load %arg9[%c0_20, %c0_21] : memref<1x1xf32, #tpu.memory_space<vmem>>, vector<1x1xf32>
    %28 = vector.broadcast %27 : vector<1x1xf32> to vector<256x1xf32>
    %29 = arith.addf %26, %28 : vector<256x1xf32>
    %c0_22 = arith.constant 0 : index
    %c0_23 = arith.constant 0 : index
    %30 = vector.load %arg10[%c0_22, %c0_23] : memref<256x1xf32, #tpu.memory_space<vmem>>, vector<256x1xf32>
    tpu.vector_store %arg10[%c0_22, %c0_23], %29 {strides = array<i32>} : memref<256x1xf32, #tpu.memory_space<vmem>>, vector<256x1xf32>,
    return
  }
  func.func @transform_0(%arg0: i32) -> (i32, i32) {
    %c0_i32 = arith.constant 0 : i32
    %c0_i32_0 = arith.constant 0 : i32
    return %arg0, %c0_i32 : i32, i32
  }
  func.func @transform_1(%arg0: i32) -> (i32, i32) {
    %c0_i32 = arith.constant 0 : i32
    %c0_i32_0 = arith.constant 0 : i32
    return %arg0, %c0_i32 : i32, i32
  }
  func.func @transform_2(%arg0: i32) -> (i32, i32) {
    %c0_i32 = arith.constant 0 : i32
    %c0_i32_0 = arith.constant 0 : i32
    %c0_i32_1 = arith.constant 0 : i32
    return %c0_i32, %c0_i32_0 : i32, i32
  }
  func.func @transform_3(%arg0: i32) -> (i32, i32) {
    %c0_i32 = arith.constant 0 : i32
    %c0_i32_0 = arith.constant 0 : i32
    %c0_i32_1 = arith.constant 0 : i32
    return %c0_i32, %c0_i32_0 : i32, i32
  }
  func.func @transform_4(%arg0: i32) -> (i32, i32) {
    %c0_i32 = arith.constant 0 : i32
    %c0_i32_0 = arith.constant 0 : i32
    %c0_i32_1 = arith.constant 0 : i32
    return %c0_i32, %c0_i32_0 : i32, i32
  }
  func.func @transform_5(%arg0: i32) -> (i32, i32) {
    %c0_i32 = arith.constant 0 : i32
    %c0_i32_0 = arith.constant 0 : i32
    %c0_i32_1 = arith.constant 0 : i32
    return %c0_i32, %c0_i32_0 : i32, i32
  }
  func.func @transform_6(%arg0: i32) -> (i32, i32) {
    %c0_i32 = arith.constant 0 : i32
    %c0_i32_0 = arith.constant 0 : i32
    %c0_i32_1 = arith.constant 0 : i32
    return %c0_i32, %c0_i32_0 : i32, i32
  }
  func.func @transform_7(%arg0: i32) -> (i32, i32) {
    %c0_i32 = arith.constant 0 : i32
    %c0_i32_0 = arith.constant 0 : i32
    %c0_i32_1 = arith.constant 0 : i32
    return %c0_i32, %c0_i32_0 : i32, i32
  }
  func.func @transform_8(%arg0: i32) -> (i32, i32) {
    %c0_i32 = arith.constant 0 : i32
    %c0_i32_0 = arith.constant 0 : i32
    %c0_i32_1 = arith.constant 0 : i32
    return %c0_i32, %c0_i32_0 : i32, i32
  }
  func.func @transform_9(%arg0: i32) -> (i32, i32) {
    %c0_i32 = arith.constant 0 : i32
    %c0_i32_0 = arith.constant 0 : i32
    return %arg0, %c0_i32 : i32, i32
  }
}

</mosaic_0001>

<bundles_post_ra>
// kernel: tpu_custom_call.1
= control target key start
LH: loop header
LB: loop body
LE: loop exit
PB: predicated region body
PF: predicated region fallthrough
CT: control target
= control target key end

     0   :  { %s3847_s0 = inlined_call_operand.hbm [shape: f32[384,256], index: 0, kind: input, shape index: {}]   ;;  %s3848_s1 = inlined_call_operand.hbm [shape: f32[384,256], index: 1, kind: input, shape index: {}]   ;;  %s3849_s2 = inlined_call_operand.hbm [shape: bf16[256,128], index: 2, kind: input, shape index: {}]   ;;  %s3850_s3 = inlined_call_operand.hbm [shape: bf16[256,128], index: 3, kind: input, shape index: {}]   ;;  %s3851_s4 = inlined_call_operand.vmem [shape: f32[1,128], index: 4, kind: input, shape index: {}]   ;;  %s3852_s5 = inlined_call_operand.vmem [shape: bf16[128,64], index: 5, kind: input, shape index: {}]   ;;  %s3853_s6 = inlined_call_operand.vmem [shape: f32[1,64], index: 6, kind: input, shape index: {}]   ;;  %s3854_s7 = inlined_call_operand.vmem [shape: f32[1,64], index: 7, kind: input, shape index: {}]   ;;  %s3855_s8 = inlined_call_operand.<no memory space> [shape: f32[1,1], index: 8, kind: input, shape index: {}]   ;;  %s3856_s9 = inlined_call_operand.vmem [shape: f32[384,1], index: 9, kind: output, shape index: {}]  }
   0x1   :  { %v14_v0 = vstv %s3855_s8 }
   0x2   :  { %15 = vst [vmem:[#allocation2] sm:$0x1] %v14_v0 }
   0x3   :  { %16 = vsyncpa [#allocation4], 0 }
   0x4   :  { %18 = vsyncpa [#allocation4 + $0x1], 0 }
   0x5   :  { %19 = vsyncpa [#allocation6], 0 }
   0x6   :  { %21 = vsyncpa [#allocation6 + $0x1], 0 }
   0x7   :  { %22 = vsyncpa [#allocation9], 0  ;;  %s3036_s11 = smov 0   ;;  %s3038_s12 = smov 0  }
   0x8   :  { %s3040_s13 = smov 0   ;;  %s3042_s14 = smov 0  }
   0x9 LB: > { %s3055_s8 = sadd.s32 4294967295, %s2939_s14   ;;  %s3058_s15 = sadd.s32 1, %s2939_s14   ;;  %s2939_s14 = sphi %s3042_s14, %s3883_s14   ;;  %s2935_s13 = sphi %s3040_s13, %s3887_s13   ;;  %s2931_s12 = sphi %s3038_s12, %s3886_s12   ;;  %s2927_s11 = sphi %s3036_s11, %s3885_s11  }
   0xa   : > { %3862 = sst [smem:[#allocation15_spill]] %s3058_s15  ;;  %s32_s16 = ssub.s32 %s2939_s14, %s3058_s15 }
   0xb   : > { %s35_s17 = sadd.s32 1, %s2935_s13  ;;  %p33_p0 = scmp.eq.s32.totalorder %s32_s16, 0 }
   0xc   : > { %p42_p1 = scmp.ne.s32.totalorder %s2935_s13, %s2931_s12  ;;  %p43_p2 = scmp.eq.s32.totalorder %s2939_s14, 0 }
   0xd   : > { %p48_p3 = scmp.ne.s32.totalorder %s2931_s12, %s2927_s11  ;;  %p3857_p5 = scmp.eq.s32.totalorder %s3055_s8, 0 }
   0xe   : > { %s3068_s18 = scalar_select %p33_p0, %s2935_s13, %s35_s17  }
   0xf   : > { %p3070_p4 = por %p43_p2, %p42_p1  ;;  %p245_p6 = scmp.eq.s32.totalorder %s3055_s8, 1 }
  0x10   : > { %3863 = sst [smem:[#allocation16_spill]] %s3068_s18  ;;  %p2174_p7 = scmp.ge.s32.totalorder %s2939_s14, 1 }
  0x11   : > { %s3864_s19 = scalar_select %p3070_p4, 1, 0 }
  0x12   : > { %p3079_p8 = por %p3857_p5, %p48_p3  ;;  %p258_p9 = scmp.lt.s32.totalorder %s2939_s14, 3 }
  0x13   : > { %p3084_p10 = por %p245_p6, %p42_p1  ;;  %s2973_s23 = smov [#allocation7]  }
  0x14   : > { %s3865_s20 = scalar_select %p3079_p8, 1, 0 }
  0x15   : > { %s3866_s21 = scalar_select %p3084_p10, 1, 0 }
  0x16   : > { %p3088_p11 = pnand %p2174_p7, %p258_p9  ;;  %s270_s24 = sshll.u32 %s2973_s23, 4  ;;  %s271_s24 = int_to_ptr.vmem [resolvable:$true] %s270_s24 }
  0x17   : > { %s2974_s26 = smov [#allocation8]   ;;  %s2749_s30 = scalar_lea.hbm %s3849_s2, 2048 }
  0x18   : > { %s3867_s22 = scalar_select %p3088_p11, 1, 0 }
  0x19   : > { %p2594_p12 = pneg %p3088_p11  ;;  %s283_s27 = sshll.u32 %s2974_s26, 4  ;;  %s3100_s27 = int_to_ptr.vmem [resolvable:$true] %s283_s27 }
  0x1a   : > { %p2750_p0 = scmp.ne.s32.totalorder %s3849_s2, %s2749_s30  ;;  %p2756_p6 = scmp.lt.u32.totalorder %s2749_s30, %s3849_s2 }
  0x1b   : > { %p3096_p13 = pnand %p2594_p12, %p3857_p5 }
  0x1d   : > { %p2751_p1 = pneg %p3096_p13 }
  0x1f   : > { %p2752_p2 = pnand %p2751_p1, %p2750_p0 }
  0x21   : > { %p2753_p3 = pneg %p2752_p2 }
  0x23   : > { %p2758_p7 = pnand %p2756_p6, %p2753_p3 }
  0x25   : > { %2761 = shalt.err (!%p2758_p7)
}
  0x26   : > { %s2762_s23 = scalar_lea.vmem %s271_s24, 2048  ;;  %p2770_p10 = scmp.lt.s32.totalorder %s271_s24, %s271_s24 }
  0x27   : > { %p2763_p9 = scmp.ne.s32.totalorder %s271_s24, %s2762_s23  ;;  %p2771_p8 = scmp.lt.s32.totalorder %s2762_s23, %s2762_s23 }
  0x29   : > { %p2765_p12 = pnand %p2763_p9, %p2751_p1  ;;  %p2772_p11 = por %p2771_p8, %p2770_p10 }
  0x2b   : > { %p2766_p5 = pneg %p2765_p12 }
  0x2d   : > { %p2773_p4 = pnand %p2772_p11, %p2766_p5 }
  0x2f   : > { %2776 = shalt.err (!%p2773_p4)
}
  0x30   : > { %s2975_s26 = smov 64   ;;  %s2976_s28 = smov 4  }
  0x31   : > { %2597 = dma.hbm_to_vmem [thread:$0]  (!%p3096_p13), %s3849_s2, 2048, %s271_s24, [#allocation6], %s2975_s26, %s2975_s26, %s2976_s28  }
  0x32   : > { %s2777_s16 = scalar_lea.hbm %s3850_s3, 2048 }
  0x33   : > { %p2778_p0 = scmp.ne.s32.totalorder %s3850_s3, %s2777_s16  ;;  %p2784_p8 = scmp.lt.u32.totalorder %s2777_s16, %s3850_s3 }
  0x35   : > { %p2780_p4 = pnand %p2778_p0, %p2751_p1 }
  0x37   : > { %p2781_p5 = pneg %p2780_p4 }
  0x39   : > { %p2786_p10 = pnand %p2784_p8, %p2781_p5 }
  0x3b   : > { %2789 = shalt.err (!%p2786_p10)
}
  0x3c   : > { %s2790_s24 = scalar_lea.vmem %s3100_s27, 2048  ;;  %p2798_p6 = scmp.lt.s32.totalorder %s3100_s27, %s3100_s27 }
  0x3d   : > { %p2791_p11 = scmp.ne.s32.totalorder %s3100_s27, %s2790_s24  ;;  %p2799_p7 = scmp.lt.s32.totalorder %s2790_s24, %s2790_s24 }
  0x3f   : > { %p2793_p2 = pnand %p2791_p11, %p2751_p1  ;;  %p2800_p9 = por %p2799_p7, %p2798_p6 }
  0x41   : > { %p2794_p3 = pneg %p2793_p2 }
  0x43   : > { %p2801_p12 = pnand %p2800_p9, %p2794_p3 }
  0x45   : > { %2804 = shalt.err (!%p2801_p12)
}
  0x46   : > { %2600 = dma.hbm_to_vmem [thread:$0]  (!%p3096_p13), %s3850_s3, 2048, %s3100_s27, [#allocation9], %s2975_s26, %s2975_s26, %s2976_s28  }
  0x47   : > { %p2177_p0 = scmp.ge.s32.totalorder %s2939_s14, 2 }
  0x48   : > { %p3869_p4 = scmp.ne.s32.totalorder (!%p2177_p0), %s3864_s19, 0 }
  0x49   : > { %308 = sbr.rel (%p2177_p0) target bundleno = 152 (0x98), region = 44 }
  0x50   : > { %311 = sbr.rel (!%p3869_p4) target bundleno = 115 (0x73), region = 48  ;;  %s312_s29 = sand.u32 (%p3869_p4), 1, %s2935_s13  }
  0x51   : > { %s2179_s30 = sshll.u32 (%p3869_p4), %s2939_s14, 5  ;;  %s2178_s10 = sshll.u32 (%p3869_p4), %s312_s29, 9 }
  0x52   : > { %s318_s11 = ssub.s32 (%p3869_p4), 48, %s2179_s30  ;;  %s3157_s17 = scalar_lea.sflag (%p3869_p4), [#allocation4], %s312_s29 }
  0x53   : > { %p319_p1 = scmp.lt.s32.totalorder (%p3869_p4), %s318_s11, 32  ;;  %s316_s27 = scalar_lea.vmem (%p3869_p4), [#allocation3], %s2178_s10 }
  0x57   : > { %s3889_s11 = smov (!%p319_p1, %s318_s11), 32 }
  0x58   : > { %s3154_s25 = sshll.u32 %s3889_s11, 8 }
  0x59   : > { %s324_s16 = ssub.s32 8192, %s3154_s25 }
  0x5a   : > { %325 = vsyncadd %s3157_s17, %s324_s16  ;;  %p2182_p13 = scmp.ne.s32.totalorder %s3154_s25, 0  ;;  %s2265_s26 = sshll.u32 %s2939_s14, 13 }
  0x5b   : > { %s3165_s24 = scalar_lea.hbm %s3847_s0, %s2265_s26  ;;  %s331_s15 = sshll.u32 %s316_s27, 4  ;;  %s3167_s15 = int_to_ptr.vmem [resolvable:$true] %s331_s15 }
  0x5c   : > { %s2805_s18 = scalar_lea.hbm %s3165_s24, %s3154_s25  ;;  %s2809_s10 = scalar_lea.hbm %s3847_s0, 12288 }
  0x5d   : > { %p2806_p5 = scmp.ne.s32.totalorder %s3165_s24, %s2805_s18  ;;  %p2810_p11 = scmp.lt.u32.totalorder %s3165_s24, %s3847_s0 }
  0x5e   : > { %p2811_p2 = scmp.lt.u32.totalorder %s2809_s10, %s2805_s18  ;;  %p2813_p6 = scmp.lt.u32.totalorder %s2805_s18, %s3165_s24 }
  0x5f   : > { %p2807_p8 = pnand %p2806_p5, %p2182_p13 }
  0x60   : > { %p2812_p3 = por %p2811_p2, %p2810_p11 }
  0x61   : > { %p2808_p10 = pneg %p2807_p8 }
  0x62   : > { %p2814_p7 = por %p2813_p6, %p2812_p3 }
  0x64   : > { %p2815_p9 = pnand %p2814_p7, %p2808_p10 }
  0x66   : > { %2818 = shalt.err (!%p2815_p9)
}
  0x67   : > { %s2819_s27 = scalar_lea.vmem %s3167_s15, %s3154_s25  ;;  %s2977_s26 = smov [#allocation3]  }
  0x68   : > { %p2820_p12 = scmp.ne.s32.totalorder %s3167_s15, %s2819_s27  ;;  %s2823_s28 = sshll.u32 %s2977_s26, 4  ;;  %s2824_s28 = int_to_ptr.vmem [resolvable:$false] %s2823_s28 }
  0x69   : > { %s2825_s23 = scalar_lea.vmem %s2824_s28, 16384  ;;  %p2826_p1 = scmp.lt.s32.totalorder %s3167_s15, %s2824_s28 }
  0x6a   : > { %p2821_p0 = pnand %p2820_p12, %p2182_p13  ;;  %p2827_p5 = scmp.lt.s32.totalorder %s2825_s23, %s2819_s27 }
  0x6c   : > { %p2822_p4 = pneg %p2821_p0  ;;  %p2828_p8 = por %p2827_p5, %p2826_p1 }
  0x6e   : > { %p2829_p11 = pnand %p2828_p8, %p2822_p4 }
  0x70   : > { %2832 = shalt.err (!%p2829_p11)
}
  0x71   : > { %s2978_s18 = smov 256   ;;  %s2979_s29 = smov 16  }
  0x72   : > { %337 = dma.hbm_to_vmem [thread:$0]  (%p2182_p13), %s3165_s24, %s3154_s25, %s3167_s15, %s3157_s17, %s2978_s18, %s2978_s18, %s2979_s29  }
  0x73 PF: > { %p3870_p10 = scmp.ne.s32.totalorder %s3864_s19, 0 }
  0x74   : > { %s341_s30 = sand.u32 (%p3870_p10), 1, %s2939_s14   ;;  %s343_s10 = sand.u32 (%p3870_p10), 1, %s2935_s13  }
  0x75   : > { %340 = sbr.rel (!%p3870_p10) target bundleno = 152 (0x98), region = 52  ;;  %s2187_s11 = sshll.u32 (%p3870_p10), %s343_s10, 9 }
  0x76   : > { %s2188_s16 = sshll.u32 (%p3870_p10), %s2939_s14, 5  ;;  %s3202_s23 = scalar_lea.sflag (%p3870_p10), [#allocation6], %s341_s30 }
  0x77   : > { %s347_s27 = ssub.s32 (%p3870_p10), 48, %s2188_s16  ;;  %s345_s25 = scalar_lea.vmem (%p3870_p10), [#allocation5], %s2187_s11 }
  0x78   : > { %p348_p2 = scmp.lt.s32.totalorder (%p3870_p10), %s347_s27, 32 }
  0x7c   : > { %s3891_s27 = smov (!%p348_p2, %s347_s27), 32 }
  0x7d   : > { %s3199_s26 = sshll.u32 %s3891_s27, 8 }
  0x7e   : > { %s353_s28 = ssub.s32 8192, %s3199_s26 }
  0x7f   : > { %354 = vsyncadd %s3202_s23, %s353_s28  ;;  %p2191_p13 = scmp.ne.s32.totalorder %s3199_s26, 0  ;;  %s2268_s19 = sshll.u32 %s2939_s14, 13 }
  0x80   : > { %s3210_s15 = scalar_lea.hbm %s3848_s1, %s2268_s19  ;;  %s360_s18 = sshll.u32 %s345_s25, 4  ;;  %s3212_s18 = int_to_ptr.vmem [resolvable:$true] %s360_s18 }
  0x81   : > { %s2833_s29 = scalar_lea.hbm %s3210_s15, %s3199_s26  ;;  %s2837_s14 = scalar_lea.hbm %s3848_s1, 12288 }
  0x82   : > { %p2834_p3 = scmp.ne.s32.totalorder %s3210_s15, %s2833_s29  ;;  %p2838_p9 = scmp.lt.u32.totalorder %s3210_s15, %s3848_s1 }
  0x83   : > { %p2839_p12 = scmp.lt.u32.totalorder %s2837_s14, %s2833_s29  ;;  %p2841_p4 = scmp.lt.u32.totalorder %s2833_s29, %s3210_s15 }
  0x84   : > { %p2835_p6 = pnand %p2834_p3, %p2191_p13 }
  0x85   : > { %p2840_p0 = por %p2839_p12, %p2838_p9 }
  0x86   : > { %p2836_p7 = pneg %p2835_p6 }
  0x87   : > { %p2842_p1 = por %p2841_p4, %p2840_p0 }
  0x89   : > { %p2843_p5 = pnand %p2842_p1, %p2836_p7 }
  0x8b   : > { %2846 = shalt.err (!%p2843_p5)
}
  0x8c   : > { %s2847_s27 = scalar_lea.vmem %s3212_s18, %s3199_s26  ;;  %s2980_s28 = smov [#allocation5]  }
  0x8d   : > { %p2848_p8 = scmp.ne.s32.totalorder %s3212_s18, %s2847_s27  ;;  %s2851_s25 = sshll.u32 %s2980_s28, 4  ;;  %s2852_s25 = int_to_ptr.vmem [resolvable:$false] %s2851_s25 }
  0x8e   : > { %s2853_s19 = scalar_lea.vmem %s2852_s25, 16384  ;;  %p2854_p2 = scmp.lt.s32.totalorder %s3212_s18, %s2852_s25 }
  0x8f   : > { %p2849_p11 = pnand %p2848_p8, %p2191_p13  ;;  %p2855_p3 = scmp.lt.s32.totalorder %s2853_s19, %s2847_s27 }
  0x91   : > { %p2850_p10 = pneg %p2849_p11  ;;  %p2856_p6 = por %p2855_p3, %p2854_p2 }
  0x93   : > { %p2857_p9 = pnand %p2856_p6, %p2850_p10 }
  0x95   : > { %2860 = shalt.err (!%p2857_p9)
}
  0x96   : > { %s2981_s17 = smov 256   ;;  %s2982_s24 = smov 16  }
  0x97   : > { %366 = dma.hbm_to_vmem [thread:$0]  (%p2191_p13), %s3210_s15, %s3199_s26, %s3212_s18, %s3202_s23, %s2981_s17, %s2981_s17, %s2982_s24  }
  0x98 PF: > { %p3871_p7 = scmp.ne.s32.totalorder %s3867_s22, 0 }
  0x99   : > { %s3242_s29 = sand.u32 (!%p3871_p7), 1, %s2931_s12   ;;  %p3872_p12 = scmp.ne.s32.totalorder (!%p3871_p7), %s3865_s20, 0 }
  0x9a   : > { %372 = sbr.rel (%p3871_p7) target bundleno = 1009 (0x3f1), region = 56  ;;  %s2197_s30 = sshll.u32 (!%p3871_p7), %s3242_s29, 9 }
  0x9b   : > { %s375_s10 = scalar_lea.sflag (!%p3871_p7), [#allocation4], %s3242_s29  ;;  %s3246_s14 = scalar_lea.vmem (!%p3871_p7), [#allocation3], %s2197_s30 }
  0xa1   : > { %2910 = dma.done.wait (%p3872_p12), %s375_s10, 8192  }
  0xa2   : > { %2912 = vsyncadd (%p3872_p12), %s375_s10, 4294959104  ;;  %s383_s26 = sand.u32 1, %s3055_s8   ;;  %s3253_s23 = scalar_lea.vmem [#allocation5], %s2197_s30 }
  0xa3   : > { %s384_s22 = scalar_lea.sflag [#allocation6], %s383_s26 }
  0xa4   : > { %2914 = dma.done.wait (%p3872_p12), %s384_s22, 8192  }
  0xa5   : > { %2916 = vsyncadd (%p3872_p12), %s384_s22, 4294959104  ;;  %p3873_p13 = scmp.eq.s32.totalorder %s3055_s8, 0 }
  0xa7   : > { %2918 = dma.done.wait (%p3873_p13), [#allocation6], 2048   ;;  %p3874_p0 = pmov %p3873_p13 }
  0xa9   : > { %2920 = vsyncadd (%p3874_p0), [#allocation6], 4294965248  ;;  %p3875_p4 = pmov %p3874_p0 }
  0xaa   : > { %p3876_p1 = pmov %p3874_p0 }
  0xab   : > { %2922 = dma.done.wait (%p3875_p4), [#allocation9], 2048  }
  0xac   : > { %2924 = vsyncadd (%p3876_p1), [#allocation9], 4294965248  ;;  %v2709_v1 = vld [vmem:[#allocation8 + $0x40] sm:$0xff]   ;;  %v2711_v3 = vld [vmem:[#allocation8 + $0x48] sm:$0xff]   ;;  %vm1612_vm0 = vcmask 523264   ;;  %s2201_s27 = sshll.u32 %s3242_s29, 8 }
  0xad   : > { %v2710_v2 = vld [vmem:[#allocation8] sm:$0xff]   ;;  %2568 = vmatprep.subr.bf16.mxu1 %v2709_v1  ;;  %2272 = vmatprep.subr.bf16.mxu0 %v2709_v1  ;;  %v2712_v4 = vld [vmem:[#allocation8 + $0x8] sm:$0xff]   ;;  %v2713_v5 = vld [vmem:[#allocation8 + $0x50] sm:$0xff]   ;;  %vm1748_vm1 = vcmask 7168   ;;  %s3609_s28 = scalar_lea.vmem [#allocation10], %s2201_s27   ;;  %p3877_p5 = scmp.ne.s32.totalorder %s3866_s21, 0 }
  0xae   : > { %2576 = vmatpush3.bf16.msra.mxu1 %v2710_v2  ;;  %2273 = vmatpush3.bf16.msra.mxu0 %v2710_v2  ;;  %v2714_v6 = vld [vmem:[#allocation8 + $0x10] sm:$0xff]   ;;  %v2715_v7 = vld [vmem:[#allocation8 + $0x58] sm:$0xff]   ;;  %v2717_v9 = vld [vmem:[#allocation8 + $0x60] sm:$0xff]   ;;  %s2247_s29 = sshll.u32 (%p3877_p5), %s3055_s8, 5  ;;  %s2269_s25 = sshll.u32 (%p3877_p5), %s3055_s8, 8 }
  0xaf   : > { %2569 = vmatprep.subr.bf16.mxu1 %v2711_v3  ;;  %2274 = vmatprep.subr.bf16.mxu0 %v2711_v3  ;;  %v2716_v8 = vld [vmem:[#allocation8 + $0x18] sm:$0xff]   ;;  %v2718_v10 = vld [vmem:[#allocation8 + $0x20] sm:$0xff]   ;;  %v2719_v11 = vld [vmem:[#allocation8 + $0x68] sm:$0xff]   ;;  %s1789_s19 = ssub.s32 (%p3877_p5), 48, %s2247_s29  ;;  %s3712_s30 = scalar_lea.vmem (%p3877_p5), %s3856_s9, %s2269_s25  }
  0xb0   : > { %v597_v12 = vld [vmem:[%s3253_s23 + $0x188] sm:$0xff]  ;;  %v599_v13 = vld [vmem:[%s3253_s23 + $0x198] sm:$0xff]  ;;  %v2721_v16 = vld [vmem:[#allocation8 + $0x70] sm:$0xff]   ;;  %p1790_p8 = scmp.lt.s32.totalorder (%p3877_p5), %s1789_s19, 32 }
  0xb1   : > { %v637_v14 = vpack.c.bf16 %v599_v13, %v597_v12  ;;  %v2720_v15 = vld [vmem:[#allocation8 + $0x28] sm:$0xff]   ;;  %v2722_v17 = vld [vmem:[#allocation8 + $0x30] sm:$0xff]   ;;  %v2723_v18 = vld [vmem:[#allocation8 + $0x78] sm:$0xff]  }
  0xb2   : > { %2577 = vmatpush3.bf16.msra.mxu1 %v2712_v4  ;;  %2275 = vmatpush3.bf16.msra.mxu0 %v2712_v4  ;;  %v2724_v19 = vld [vmem:[#allocation8 + $0x38] sm:$0xff]   ;;  %v596_v20 = vld [vmem:[%s3253_s23 + $0x180] sm:$0xff]  ;;  %v598_v21 = vld [vmem:[%s3253_s23 + $0x190] sm:$0xff] }
  0xb3   : > { %2570 = vmatprep.subr.bf16.mxu1 %v2713_v5  ;;  %2276 = vmatprep.subr.bf16.mxu0 %v2713_v5  ;;  %v2725_v22 = vld [vmem:[#allocation7 + $0x40] sm:$0xff]   ;;  %v601_v23 = vld [vmem:[%s3253_s23 + $0x1a8] sm:$0xff]  ;;  %v603_v24 = vld [vmem:[%s3253_s23 + $0x1b8] sm:$0xff]  ;;  %v636_v25 = vpack.c.bf16 %v598_v21, %v596_v20 }
  0xb4   : > { %932 = vmatprep.mubr.bf16.mxu1 %v637_v14  ;;  %v2726_v26 = vld [vmem:[#allocation7] sm:$0xff]   ;;  %v639_v27 = vpack.c.bf16 %v603_v24, %v601_v23  ;;  %v2727_v28 = vld [vmem:[#allocation7 + $0x48] sm:$0xff]   ;;  %v602_v31 = vld [vmem:[%s3253_s23 + $0x1b0] sm:$0xff] }
  0xb5   : > { %v2728_v29 = vld [vmem:[#allocation7 + $0x8] sm:$0xff]   ;;  %v600_v30 = vld [vmem:[%s3253_s23 + $0x1a0] sm:$0xff]  ;;  %v2729_v32 = vld [vmem:[#allocation7 + $0x50] sm:$0xff]  }
  0xb6   : > { %2578 = vmatpush3.bf16.msra.mxu1 %v2714_v6  ;;  %2277 = vmatpush3.bf16.msra.mxu0 %v2714_v6  ;;  %v605_v33 = vld [vmem:[%s3253_s23 + $0x1c8] sm:$0xff]  ;;  %v607_v34 = vld [vmem:[%s3253_s23 + $0x1d8] sm:$0xff]  ;;  %v638_v37 = vpack.c.bf16 %v602_v31, %v600_v30  ;;  %v548_v39 = vld [vmem:[%s3253_s23] sm:$0xff] }
  0xb7   : > { %2571 = vmatprep.subr.bf16.mxu1 %v2715_v7  ;;  %2278 = vmatprep.subr.bf16.mxu0 %v2715_v7  ;;  %v549_v35 = vld [vmem:[%s3253_s23 + $0x8] sm:$0xff]  ;;  %v551_v36 = vld [vmem:[%s3253_s23 + $0x18] sm:$0xff]  ;;  %v2730_v40 = vld [vmem:[#allocation7 + $0x10] sm:$0xff]   ;;  %v641_v41 = vpack.c.bf16 %v607_v34, %v605_v33 }
  0xb8   : > { %v613_v38 = vpack.c.bf16 %v551_v36, %v549_v35  ;;  %v550_v42 = vld [vmem:[%s3253_s23 + $0x10] sm:$0xff]  ;;  %v2731_v43 = vld [vmem:[#allocation7 + $0x58] sm:$0xff]   ;;  %v553_v45 = vld [vmem:[%s3253_s23 + $0x28] sm:$0xff] }
  0xb9   : > { %v612_v44 = vpack.c.bf16 %v550_v42, %v548_v39  ;;  %v555_v46 = vld [vmem:[%s3253_s23 + $0x38] sm:$0xff]  ;;  %v604_v49 = vld [vmem:[%s3253_s23 + $0x1c0] sm:$0xff]  ;;  %v606_v50 = vld [vmem:[%s3253_s23 + $0x1d0] sm:$0xff] }
  0xba   : > { %2579 = vmatpush3.bf16.msra.mxu1 %v2716_v8  ;;  %2279 = vmatpush3.bf16.msra.mxu0 %v2716_v8  ;;  %v615_v47 = vpack.c.bf16 %v555_v46, %v553_v45  ;;  %v2732_v48 = vld [vmem:[#allocation7 + $0x18] sm:$0xff]   ;;  %v552_v51 = vld [vmem:[%s3253_s23 + $0x20] sm:$0xff]  ;;  %v554_v52 = vld [vmem:[%s3253_s23 + $0x30] sm:$0xff]  ;;  %v640_v58 = vpack.c.bf16 %v606_v50, %v604_v49 }
  0xbb   : > { %2572 = vmatprep.subr.bf16.mxu1 %v2717_v9  ;;  %2280 = vmatprep.subr.bf16.mxu0 %v2717_v9  ;;  %v2733_v53 = vld [vmem:[#allocation7 + $0x60] sm:$0xff]   ;;  %v609_v54 = vld [vmem:[%s3253_s23 + $0x1e8] sm:$0xff]  ;;  %v611_v55 = vld [vmem:[%s3253_s23 + $0x1f8] sm:$0xff]  ;;  %v614_v59 = vpack.c.bf16 %v554_v52, %v552_v51 }
  0xbc   : > { %836 = vmatprep.mubr.bf16.mxu0 %v613_v38  ;;  %v557_v56 = vld [vmem:[%s3253_s23 + $0x48] sm:$0xff]  ;;  %v559_v57 = vld [vmem:[%s3253_s23 + $0x58] sm:$0xff]  ;;  %v2734_v60 = vld [vmem:[#allocation7 + $0x20] sm:$0xff]   ;;  %v643_v61 = vpack.c.bf16 %v611_v55, %v609_v54 }
  0xbd   : > { %v2735_v62 = vld [vmem:[#allocation7 + $0x68] sm:$0xff]   ;;  %v617_v63 = vpack.c.bf16 %v559_v57, %v557_v56  ;;  %v608_v1 = vld [vmem:[%s3253_s23 + $0x1e0] sm:$0xff]  ;;  %v610_v2 = vld [vmem:[%s3253_s23 + $0x1f0] sm:$0xff] }
  0xbe   : > { %2580 = vmatpush3.bf16.msra.mxu1 %v2718_v10  ;;  %2281 = vmatpush3.bf16.msra.mxu0 %v2718_v10  ;;  %v2736_v0 = vld [vmem:[#allocation7 + $0x28] sm:$0xff]   ;;  %v556_v3 = vld [vmem:[%s3253_s23 + $0x40] sm:$0xff]  ;;  %v558_v4 = vld [vmem:[%s3253_s23 + $0x50] sm:$0xff]  ;;  %v642_v10 = vpack.c.bf16 %v610_v2, %v608_v1 }
  0xbf   : > { %2573 = vmatprep.subr.bf16.mxu1 %v2719_v11  ;;  %2282 = vmatprep.subr.bf16.mxu0 %v2719_v11  ;;  %v2737_v5 = vld [vmem:[#allocation7 + $0x70] sm:$0xff]   ;;  %v453_v6 = vld [vmem:[%s3246_s14 + $0x8] sm:$0xff]  ;;  %v455_v7 = vld [vmem:[%s3246_s14 + $0x18] sm:$0xff]  ;;  %v616_v11 = vpack.c.bf16 %v558_v4, %v556_v3 }
  0xc0   : > { %v561_v8 = vld [vmem:[%s3253_s23 + $0x68] sm:$0xff]  ;;  %v563_v9 = vld [vmem:[%s3253_s23 + $0x78] sm:$0xff]  ;;  %v2738_v12 = vld [vmem:[#allocation7 + $0x30] sm:$0xff]   ;;  %v517_v13 = vpack.c.bf16 %v455_v7, %v453_v6 }
  0xc1   : > { %v2739_v14 = vld [vmem:[#allocation7 + $0x78] sm:$0xff]   ;;  %v560_v20 = vld [vmem:[%s3253_s23 + $0x60] sm:$0xff]  ;;  %v562_v21 = vld [vmem:[%s3253_s23 + $0x70] sm:$0xff] }
  0xc2   : > { %2581 = vmatpush3.bf16.msra.mxu1 %v2720_v15  ;;  %2283 = vmatpush3.bf16.msra.mxu0 %v2720_v15  ;;  %v619_v15 = vpack.c.bf16 %v563_v9, %v561_v8  ;;  %v565_v23 = vld [vmem:[%s3253_s23 + $0x88] sm:$0xff]  ;;  %v567_v24 = vld [vmem:[%s3253_s23 + $0x98] sm:$0xff]  ;;  %v458_v30 = vld [vmem:[%s3246_s14 + $0x30] sm:$0xff] }
  0xc3   : > { %2574 = vmatprep.subr.bf16.mxu1 %v2721_v16  ;;  %2284 = vmatprep.subr.bf16.mxu0 %v2721_v16  ;;  %v2740_v16 = vld [vmem:[#allocation7 + $0x38] sm:$0xff]   ;;  %v461_v31 = vld [vmem:[%s3246_s14 + $0x48] sm:$0xff]  ;;  %v566_v33 = vld [vmem:[%s3253_s23 + $0x90] sm:$0xff] }
  0xc4   : > { %v463_v34 = vld [vmem:[%s3246_s14 + $0x58] sm:$0xff]  ;;  %v569_v35 = vld [vmem:[%s3253_s23 + $0xa8] sm:$0xff]  ;;  %v462_v42 = vld [vmem:[%s3246_s14 + $0x50] sm:$0xff] }
  0xc5   : > { %v571_v36 = vld [vmem:[%s3253_s23 + $0xb8] sm:$0xff]  ;;  %v521_v39 = vpack.c.bf16 %v463_v34, %v461_v31  ;;  %v465_v45 = vld [vmem:[%s3246_s14 + $0x68] sm:$0xff]  ;;  %v466_v54 = vld [vmem:[%s3246_s14 + $0x70] sm:$0xff] }
  0xc6   : > { %2582 = vmatpush3.bf16.msra.mxu1 %v2722_v17  ;;  %2285 = vmatpush3.bf16.msra.mxu0 %v2722_v17  ;;  %v452_v17 = vld [vmem:[%s3246_s14] sm:$0xff]  ;;  %v467_v46 = vld [vmem:[%s3246_s14 + $0x78] sm:$0xff]  ;;  %v469_v55 = vld [vmem:[%s3246_s14 + $0x88] sm:$0xff] }
  0xc7   : > { %2575 = vmatprep.subr.bf16.mxu1 %v2723_v18  ;;  %2286 = vmatprep.subr.bf16.mxu0 %v2723_v18  ;;  %v454_v18 = vld [vmem:[%s3246_s14 + $0x10] sm:$0xff]  ;;  %v523_v51 = vpack.c.bf16 %v467_v46, %v465_v45  ;;  %v572_v56 = vld [vmem:[%s3253_s23 + $0xc0] sm:$0xff]  ;;  %v473_v3 = vld [vmem:[%s3246_s14 + $0xa8] sm:$0xff] }
  0xc8   : > { %v574_v57 = vld [vmem:[%s3253_s23 + $0xd0] sm:$0xff]  ;;  %v468_v1 = vld [vmem:[%s3246_s14 + $0x80] sm:$0xff]  ;;  %v475_v6 = vld [vmem:[%s3246_s14 + $0xb8] sm:$0xff] }
  0xc9   : > { %v470_v2 = vld [vmem:[%s3246_s14 + $0x90] sm:$0xff]  ;;  %v576_v4 = vld [vmem:[%s3253_s23 + $0xe0] sm:$0xff]  ;;  %v581_v7 = vld [vmem:[%s3253_s23 + $0x108] sm:$0xff] }
  0xca   : > { %2583 = vmatpush3.bf16.msra.mxu1 %v2724_v19  ;;  %2287 = vmatpush3.bf16.msra.mxu0 %v2724_v19  ;;  %v457_v19 = vld [vmem:[%s3246_s14 + $0x28] sm:$0xff]  ;;  %v583_v8 = vld [vmem:[%s3253_s23 + $0x118] sm:$0xff]  ;;  %v524_v9 = vpack.c.bf16 %v470_v2, %v468_v1  ;;  %v492_v1 = vld [vmem:[%s3246_s14 + $0x140] sm:$0xff] }
  0xcb   : > { %2384 = vmatprep.subr.bf16.mxu1 %v2725_v22  ;;  %v459_v22 = vld [vmem:[%s3246_s14 + $0x38] sm:$0xff]  ;;  %v589_v31 = vld [vmem:[%s3253_s23 + $0x148] sm:$0xff]  ;;  %v494_v2 = vld [vmem:[%s3246_s14 + $0x150] sm:$0xff] }
  0xcd   : > { %933 = vmatmul.mubr.bf16.vlgmr.msra.gmra.mrb[0].mxu1 %v636_v25  ;;  %837 = vmatmul.mubr.bf16.vlgmr.msra.gmra.mrb[0].mxu0 %v612_v44  ;;  %v516_v25 = vpack.c.bf16 %v454_v18, %v452_v17  ;;  %v570_v44 = vld [vmem:[%s3253_s23 + $0xb0] sm:$0xff]  ;;  %v479_v18 = vld [vmem:[%s3246_s14 + $0xd8] sm:$0xff] }
  0xce   : > { %2385 = vmatpush3.bf16.msra.mxu1 %v2726_v26  ;;  %940 = vmatprep.mubr.bf16.mxu1 %v639_v27  ;;  %v618_v26 = vpack.c.bf16 %v562_v21, %v560_v20  ;;  %v519_v27 = vpack.c.bf16 %v459_v22, %v457_v19  ;;  %v582_v17 = vld [vmem:[%s3253_s23 + $0x110] sm:$0xff]  ;;  %v585_v19 = vld [vmem:[%s3253_s23 + $0x128] sm:$0xff]  ;;  %v587_v20 = vld [vmem:[%s3253_s23 + $0x138] sm:$0xff] }
  0xcf   : > { %2386 = vmatprep.subr.bf16.mxu1 %v2727_v28  ;;  %844 = vmatprep.mubr.bf16.mxu0 %v615_v47  ;;  %v621_v28 = vpack.c.bf16 %v567_v24, %v565_v23  ;;  %v573_v47 = vld [vmem:[%s3253_s23 + $0xc8] sm:$0xff]  ;;  %v631_v24 = vpack.c.bf16 %v587_v20, %v585_v19  ;;  %v507_v20 = vld [vmem:[%s3246_s14 + $0x1b8] sm:$0xff] }
  0xd0   : > { %v505_v19 = vld [vmem:[%s3246_s14 + $0x1a8] sm:$0xff] }
  0xd2   : > { %2387 = vmatpush3.bf16.msra.mxu1 %v2728_v29  ;;  %v456_v29 = vld [vmem:[%s3246_s14 + $0x20] sm:$0xff] }
  0xd3   : > { %2388 = vmatprep.subr.bf16.mxu1 %v2729_v32  ;;  %v564_v32 = vld [vmem:[%s3253_s23 + $0x80] sm:$0xff] }
  0xd4   : > { %v620_v38 = vpack.c.bf16 %v566_v33, %v564_v32  ;;  %v591_v32 = vld [vmem:[%s3253_s23 + $0x158] sm:$0xff] }
  0xd5   : > { %941 = vmatmul.mubr.bf16.gmra.mrb[4].mxu1 %v638_v37  ;;  %845 = vmatmul.mubr.bf16.gmra.mrb[4].mxu0 %v614_v59  ;;  %v518_v37 = vpack.c.bf16 %v458_v30, %v456_v29  ;;  %v577_v59 = vld [vmem:[%s3253_s23 + $0xe8] sm:$0xff]  ;;  %v586_v29 = vld [vmem:[%s3253_s23 + $0x130] sm:$0xff]  ;;  %v483_v30 = vld [vmem:[%s3246_s14 + $0xf8] sm:$0xff] }
  0xd6   : > { %2389 = vmatpush3.bf16.msra.mxu1 %v2730_v40  ;;  %948 = vmatprep.mubr.bf16.mxu1 %v641_v41  ;;  %v623_v40 = vpack.c.bf16 %v571_v36, %v569_v35  ;;  %v460_v41 = vld [vmem:[%s3246_s14 + $0x40] sm:$0xff]  ;;  %v633_v36 = vpack.c.bf16 %v591_v32, %v589_v31 }
  0xd7   : > { %2390 = vmatprep.subr.bf16.mxu1 %v2731_v43  ;;  %852 = vmatprep.mubr.bf16.mxu0 %v617_v63  ;;  %v568_v43 = vld [vmem:[%s3253_s23 + $0xa0] sm:$0xff]  ;;  %v520_v49 = vpack.c.bf16 %v462_v42, %v460_v41  ;;  %v590_v41 = vld [vmem:[%s3253_s23 + $0x150] sm:$0xff]  ;;  %v487_v42 = vld [vmem:[%s3246_s14 + $0x118] sm:$0xff] }
  0xd8   : > { %v622_v50 = vpack.c.bf16 %v570_v44, %v568_v43  ;;  %v593_v43 = vld [vmem:[%s3253_s23 + $0x168] sm:$0xff]  ;;  %v595_v44 = vld [vmem:[%s3253_s23 + $0x178] sm:$0xff]  ;;  %v508_v32 = vld [vmem:[%s3246_s14 + $0x1c0] sm:$0xff] }
  0xda   : > { %2391 = vmatpush3.bf16.msra.mxu1 %v2732_v48  ;;  %v575_v48 = vld [vmem:[%s3253_s23 + $0xd8] sm:$0xff] }
  0xdb   : > { %2392 = vmatprep.subr.bf16.mxu1 %v2733_v53  ;;  %v625_v52 = vpack.c.bf16 %v575_v48, %v573_v47  ;;  %v464_v53 = vld [vmem:[%s3246_s14 + $0x60] sm:$0xff]  ;;  %v635_v48 = vpack.c.bf16 %v595_v44, %v593_v43 }
  0xdd   : > { %949 = vmatmul.mubr.bf16.gmra.mrb[8].mxu1 %v640_v58  ;;  %853 = vmatmul.mubr.bf16.gmra.mrb[8].mxu0 %v616_v11  ;;  %v471_v58 = vld [vmem:[%s3246_s14 + $0x98] sm:$0xff]  ;;  %v527_v11 = vpack.c.bf16 %v475_v6, %v473_v3  ;;  %v497_v3 = vld [vmem:[%s3246_s14 + $0x168] sm:$0xff]  ;;  %v536_v6 = vpack.c.bf16 %v494_v2, %v492_v1 }
  0xde   : > { %2393 = vmatpush3.bf16.msra.mxu1 %v2734_v60  ;;  %956 = vmatprep.mubr.bf16.mxu1 %v643_v61  ;;  %v579_v60 = vld [vmem:[%s3253_s23 + $0xf8] sm:$0xff]  ;;  %v522_v61 = vpack.c.bf16 %v466_v54, %v464_v53  ;;  %v525_v63 = vpack.c.bf16 %v471_v58, %v469_v55  ;;  %v489_v53 = vld [vmem:[%s3246_s14 + $0x128] sm:$0xff] }
  0xdf   : > { %2394 = vmatprep.subr.bf16.mxu1 %v2735_v62  ;;  %860 = vmatprep.mubr.bf16.mxu0 %v619_v15  ;;  %v624_v62 = vpack.c.bf16 %v574_v57, %v572_v56  ;;  %v477_v15 = vld [vmem:[%s3246_s14 + $0xc8] sm:$0xff]  ;;  %v491_v54 = vld [vmem:[%s3246_s14 + $0x138] sm:$0xff] }
  0xe0   : > { %v529_v23 = vpack.c.bf16 %v479_v18, %v477_v15  ;;  %v535_v57 = vpack.c.bf16 %v491_v54, %v489_v53  ;;  %v2741_v58 = vld [vmem:[%s3852_s5] sm:$0xff]   ;;  %v502_v18 = vld [vmem:[%s3246_s14 + $0x190] sm:$0xff] }
  0xe1   : > { %2520 = vmatprep.subr.bf16.mxu0 %v2741_v58 }
  0xe2   : > { %2395 = vmatpush3.bf16.msra.mxu1 %v2736_v0  ;;  %v627_v0 = vpack.c.bf16 %v579_v60, %v577_v59  ;;  %v488_v59 = vld [vmem:[%s3246_s14 + $0x120] sm:$0xff]  ;;  %v490_v60 = vld [vmem:[%s3246_s14 + $0x130] sm:$0xff]  ;;  %2521 = vmatpush3.bf16.msra.mxu0 %v2741_v58 }
  0xe3   : > { %2396 = vmatprep.subr.bf16.mxu1 %v2737_v5  ;;  %v578_v5 = vld [vmem:[%s3253_s23 + $0xf0] sm:$0xff] }
  0xe5   : > { %957 = vmatmul.mubr.bf16.gmra.mrb[12].mxu1 %v642_v10  ;;  %861 = vmatmul.mubr.bf16.gmra.mrb[12].mxu0 %v618_v26  ;;  %v626_v10 = vpack.c.bf16 %v578_v5, %v576_v4  ;;  %v478_v26 = vld [vmem:[%s3246_s14 + $0xd0] sm:$0xff]  ;;  %v499_v4 = vld [vmem:[%s3246_s14 + $0x178] sm:$0xff]  ;;  %v2742_v5 = vld [vmem:[%s3852_s5 + $0x8] sm:$0xff]  }
  0xe6   : > { %2397 = vmatpush3.bf16.msra.mxu1 %v2738_v12  ;;  %1093 = vmatprep.mubr.bf16.mxu1 %v517_v13  ;;  %v629_v12 = vpack.c.bf16 %v583_v8, %v581_v7  ;;  %v472_v13 = vld [vmem:[%s3246_s14 + $0xa0] sm:$0xff]  ;;  %v539_v7 = vpack.c.bf16 %v499_v4, %v497_v3  ;;  %v2743_v8 = vld [vmem:[%s3852_s5 + $0x10] sm:$0xff]  }
  0xe7   : > { %2398 = vmatprep.subr.bf16.mxu1 %v2739_v14  ;;  %868 = vmatprep.mubr.bf16.mxu0 %v621_v28  ;;  %v474_v14 = vld [vmem:[%s3246_s14 + $0xb0] sm:$0xff]  ;;  %v584_v28 = vld [vmem:[%s3253_s23 + $0x120] sm:$0xff] }
  0xe8   : > { %v526_v21 = vpack.c.bf16 %v474_v14, %v472_v13  ;;  %v630_v34 = vpack.c.bf16 %v586_v29, %v584_v28  ;;  %2522 = vmatprep.subr.bf16.mxu0 %v2742_v5  ;;  %v2744_v13 = vld [vmem:[%s3852_s5 + $0x18] sm:$0xff]  }
  0xe9   : > { %2523 = vmatpush3.bf16.msra.mxu0 %v2742_v5  ;;  %v511_v28 = vld [vmem:[%s3246_s14 + $0x1d8] sm:$0xff] }
  0xea   : > { %2399 = vmatpush3.bf16.msra.mxu1 %v2740_v16  ;;  %v580_v16 = vld [vmem:[%s3253_s23 + $0x100] sm:$0xff]  ;;  %2524 = vmatprep.subr.bf16.mxu0 %v2743_v8  ;;  %v2748_v29 = vld [vmem:[%s3852_s5 + $0x38] sm:$0xff]  }
  0xeb   : > { %v628_v22 = vpack.c.bf16 %v582_v17, %v580_v16  ;;  %v2745_v16 = vld [vmem:[%s3852_s5 + $0x20] sm:$0xff]  }
  0xec   : > { %v500_v17 = vld [vmem:[%s3246_s14 + $0x180] sm:$0xff] }
  0xed   : > { %1094 = vmatmul.mubr.bf16.vlgmr.msra.gmra.mrb[16].mxu1 %v516_v25  ;;  %869 = vmatmul.mubr.bf16.gmra.mrb[16].mxu0 %v620_v38  ;;  %v476_v25 = vld [vmem:[%s3246_s14 + $0xc0] sm:$0xff]  ;;  %v482_v38 = vld [vmem:[%s3246_s14 + $0xf0] sm:$0xff] }
  0xee   : > { %1101 = vmatprep.mubr.bf16.mxu1 %v519_v27  ;;  %876 = vmatprep.mubr.bf16.mxu0 %v623_v40  ;;  %v481_v27 = vld [vmem:[%s3246_s14 + $0xe8] sm:$0xff]  ;;  %v528_v33 = vpack.c.bf16 %v478_v26, %v476_v25  ;;  %v588_v40 = vld [vmem:[%s3253_s23 + $0x140] sm:$0xff]  ;;  %v506_v26 = vld [vmem:[%s3246_s14 + $0x1b0] sm:$0xff] }
  0xef   : > { %v531_v35 = vpack.c.bf16 %v483_v30, %v481_v27  ;;  %v632_v46 = vpack.c.bf16 %v590_v41, %v588_v40  ;;  %2525 = vmatpush3.bf16.msra.mxu0 %v2743_v8  ;;  %v504_v25 = vld [vmem:[%s3246_s14 + $0x1a0] sm:$0xff]  ;;  %v509_v27 = vld [vmem:[%s3246_s14 + $0x1c8] sm:$0xff] }
  0xf0   : > { %2526 = vmatprep.subr.bf16.mxu0 %v2744_v13  ;;  %v542_v30 = vpack.c.bf16 %v506_v26, %v504_v25  ;;  %v545_v31 = vpack.c.bf16 %v511_v28, %v509_v27  ;;  %v3440_v27 = vld [vmem:[%s3851_s4] ss:$0 sm:$0xff] }
  0xf3   : > { %2527 = vmatpush3.bf16.msra.mxu0 %v2744_v13 }
  0xf4   : > { %2528 = vmatprep.subr.bf16.mxu0 %v2745_v16 }
  0xf5   : > { %1102 = vmatmul.mubr.bf16.gmra.mrb[20].mxu1 %v518_v37  ;;  %877 = vmatmul.mubr.bf16.gmra.mrb[20].mxu0 %v622_v50  ;;  %v480_v37 = vld [vmem:[%s3246_s14 + $0xe0] sm:$0xff]  ;;  %v486_v50 = vld [vmem:[%s3246_s14 + $0x110] sm:$0xff] }
  0xf6   : > { %1109 = vmatprep.mubr.bf16.mxu1 %v521_v39  ;;  %884 = vmatprep.mubr.bf16.mxu0 %v625_v52  ;;  %v485_v39 = vld [vmem:[%s3246_s14 + $0x108] sm:$0xff]  ;;  %v530_v45 = vpack.c.bf16 %v482_v38, %v480_v37  ;;  %v594_v52 = vld [vmem:[%s3253_s23 + $0x170] sm:$0xff]  ;;  %v512_v38 = vld [vmem:[%s3246_s14 + $0x1e0] sm:$0xff] }
  0xf7   : > { %v533_v47 = vpack.c.bf16 %v487_v42, %v485_v39  ;;  %2529 = vmatpush3.bf16.msra.mxu0 %v2745_v16  ;;  %v514_v39 = vld [vmem:[%s3246_s14 + $0x1f0] sm:$0xff] }
  0xf8   : > { %v546_v40 = vpack.c.bf16 %v514_v39, %v512_v38 }
  0xfd   : > { %1110 = vmatmul.mubr.bf16.gmra.mrb[24].mxu1 %v520_v49  ;;  %885 = vmatmul.mubr.bf16.gmra.mrb[24].mxu0 %v624_v62  ;;  %v484_v49 = vld [vmem:[%s3246_s14 + $0x100] sm:$0xff]  ;;  %v495_v62 = vld [vmem:[%s3246_s14 + $0x158] sm:$0xff] }
  0xfe   : > { %1117 = vmatprep.mubr.bf16.mxu1 %v523_v51  ;;  %892 = vmatprep.mubr.bf16.mxu0 %v627_v0  ;;  %v592_v51 = vld [vmem:[%s3253_s23 + $0x160] sm:$0xff]  ;;  %v532_v55 = vpack.c.bf16 %v486_v50, %v484_v49 }
  0xff   : > { %v634_v56 = vpack.c.bf16 %v594_v52, %v592_v51 }
 0x105   : > { %1118 = vmatmul.mubr.bf16.gmra.mrb[28].mxu1 %v522_v61  ;;  %893 = vmatmul.mubr.bf16.gmra.mrb[28].mxu0 %v626_v10  ;;  %v493_v61 = vld [vmem:[%s3246_s14 + $0x148] sm:$0xff]  ;;  %v498_v10 = vld [vmem:[%s3246_s14 + $0x170] sm:$0xff] }
 0x106   : > { %1125 = vmatprep.mubr.bf16.mxu1 %v525_v63  ;;  %900 = vmatprep.mubr.bf16.mxu0 %v629_v12  ;;  %v534_v63 = vpack.c.bf16 %v490_v60, %v488_v59  ;;  %v537_v0 = vpack.c.bf16 %v495_v62, %v493_v61  ;;  %v503_v12 = vld [vmem:[%s3246_s14 + $0x198] sm:$0xff] }
 0x10d   : > { %1126 = vmatmul.mubr.bf16.gmra.mrb[32].mxu1 %v524_v9  ;;  %901 = vmatmul.mubr.bf16.gmra.mrb[32].mxu0 %v628_v22  ;;  %v496_v9 = vld [vmem:[%s3246_s14 + $0x160] sm:$0xff]  ;;  %v540_v22 = vpack.c.bf16 %v502_v18, %v500_v17 }
 0x10e   : > { %1133 = vmatprep.mubr.bf16.mxu1 %v527_v11  ;;  %908 = vmatprep.mubr.bf16.mxu0 %v631_v24  ;;  %v501_v11 = vld [vmem:[%s3246_s14 + $0x188] sm:$0xff]  ;;  %v538_v14 = vpack.c.bf16 %v498_v10, %v496_v9 }
 0x10f   : > { %v541_v15 = vpack.c.bf16 %v503_v12, %v501_v11  ;;  %v2747_v24 = vld [vmem:[%s3852_s5 + $0x30] sm:$0xff]  }
 0x115   : > { %1134 = vmatmul.mubr.bf16.gmra.mrb[36].mxu1 %v526_v21  ;;  %909 = vmatmul.mubr.bf16.gmra.mrb[36].mxu0 %v630_v34  ;;  %v2746_v21 = vld [vmem:[%s3852_s5 + $0x28] sm:$0xff]  }
 0x116   : > { %1141 = vmatprep.mubr.bf16.mxu1 %v529_v23  ;;  %916 = vmatprep.mubr.bf16.mxu0 %v633_v36  ;;  %v543_v23 = vpack.c.bf16 %v507_v20, %v505_v19  ;;  %v513_v34 = vld [vmem:[%s3246_s14 + $0x1e8] sm:$0xff] }
 0x117   : > { %2530 = vmatprep.subr.bf16.mxu0 %v2746_v21 }
 0x118   : > { %2531 = vmatpush3.bf16.msra.mxu0 %v2746_v21 }
 0x119   : > { %2532 = vmatprep.subr.bf16.mxu0 %v2747_v24 }
 0x11c   : > { %2533 = vmatpush3.bf16.msra.mxu0 %v2747_v24 }
 0x11d   : > { %1142 = vmatmul.mubr.bf16.gmra.mrb[40].mxu1 %v528_v33  ;;  %917 = vmatmul.mubr.bf16.gmra.mrb[40].mxu0 %v632_v46  ;;  %v510_v33 = vld [vmem:[%s3246_s14 + $0x1d0] sm:$0xff] }
 0x11e   : > { %1149 = vmatprep.mubr.bf16.mxu1 %v531_v35  ;;  %924 = vmatprep.mubr.bf16.mxu0 %v635_v48  ;;  %v515_v35 = vld [vmem:[%s3246_s14 + $0x1f8] sm:$0xff]  ;;  %v544_v36 = vpack.c.bf16 %v510_v33, %v508_v32 }
 0x11f   : > { %2534 = vmatprep.subr.bf16.mxu0 %v2748_v29  ;;  %v547_v37 = vpack.c.bf16 %v515_v35, %v513_v34 }
 0x120   : > { %2535 = vmatpush3.bf16.msra.mxu0 %v2748_v29 }
 0x125   : > { %1150 = vmatmul.mubr.bf16.gmra.mrb[44].mxu1 %v530_v45  ;;  %925 = vmatmul.mubr.bf16.gmra.mrb[44].mxu0 %v634_v56 }
 0x126   : > { %1157 = vmatprep.mubr.bf16.mxu1 %v533_v47 }
 0x12d   : > { %1158 = vmatmul.mubr.bf16.gmra.mrb[48].mxu1 %v532_v55 }
 0x12e   : > { %1165 = vmatprep.mubr.bf16.mxu1 %v535_v57 }
 0x135   : > { %1166 = vmatmul.mubr.bf16.gmra.mrb[52].mxu1 %v534_v63 }
 0x136   : > { %1173 = vmatprep.mubr.bf16.mxu1 %v537_v0 }
 0x13d   : > { %1174 = vmatmul.mubr.bf16.gmra.mrb[56].mxu1 %v536_v6 }
 0x13e   : > { %1181 = vmatprep.mubr.bf16.mxu1 %v539_v7 }
 0x145   : > { %1182 = vmatmul.mubr.bf16.gmra.mrb[60].mxu1 %v538_v14 }
 0x146   : > { %1189 = vmatprep.mubr.bf16.mxu1 %v541_v15 }
 0x14d   : > { %1190 = vmatmul.mubr.bf16.gmra.mrb[64].mxu1 %v540_v22 }
 0x14e   : > { %1197 = vmatprep.mubr.bf16.mxu1 %v543_v23 }
 0x155   : > { %1198 = vmatmul.mubr.bf16.gmra.mrb[68].mxu1 %v542_v30 }
 0x156   : > { %1205 = vmatprep.mubr.bf16.mxu1 %v545_v31 }
 0x15d   : > { %1206 = vmatmul.mubr.bf16.gmra.mrb[72].mxu1 %v544_v36 }
 0x15e   : > { %1213 = vmatprep.mubr.bf16.mxu1 %v547_v37 }
 0x165   : > { %1214 = vmatmul.mubr.bf16.gmra.mrb[76].mxu1 %v546_v40 }
 0x1a0   : > { %v2360_v41 = vpop.f32.mrb[0].mxu1  ;;  %v2288_v48 = vpop.f32.mrb[0].mxu0 }
 0x1a1   : > { %v2361_v42 = vpop.f32.mrb[1].mxu1  ;;  %v2289_v50 = vpop.f32.mrb[1].mxu0 }
 0x1a2   : > { %v3419_v43 = vadd.f32 %v2361_v42, %v2360_v41  ;;  %v2363_v44 = vpop.f32.mrb[2].mxu1  ;;  %v2290_v53 = vadd.f32 %v2289_v50, %v2288_v48  ;;  %v2291_v54 = vpop.f32.mrb[2].mxu0 }
 0x1a3   : > { %v2364_v45 = vpop.f32.mrb[3].mxu1  ;;  %v2292_v56 = vpop.f32.mrb[3].mxu0 }
 0x1a4   : > { %v3421_v46 = vadd.f32 %v2364_v45, %v2363_v44  ;;  %v2293_v58 = vadd.f32 %v2292_v56, %v2291_v54 }
 0x1a8   : > { %v2366_v47 = vpop.f32.mrb[4].mxu1  ;;  %v2294_v60 = vpop.f32.mrb[4].mxu0 }
 0x1a9   : > { %v2367_v49 = vpop.f32.mrb[5].mxu1  ;;  %v2295_v62 = vpop.f32.mrb[5].mxu0 }
 0x1aa   : > { %v3423_v51 = vadd.f32 %v2367_v49, %v2366_v47  ;;  %v2369_v52 = vpop.f32.mrb[6].mxu1  ;;  %v2296_v1 = vadd.f32 %v2295_v62, %v2294_v60  ;;  %v2297_v2 = vpop.f32.mrb[6].mxu0 }
 0x1ab   : > { %v2370_v55 = vpop.f32.mrb[7].mxu1  ;;  %v2298_v4 = vpop.f32.mrb[7].mxu0 }
 0x1ac   : > { %v3425_v57 = vadd.f32 %v2370_v55, %v2369_v52  ;;  %v2299_v6 = vadd.f32 %v2298_v4, %v2297_v2 }
 0x1b0   : > { %v2372_v59 = vpop.f32.mrb[8].mxu1  ;;  %v2300_v8 = vpop.f32.mrb[8].mxu0 }
 0x1b1   : > { %v2373_v61 = vpop.f32.mrb[9].mxu1  ;;  %v2301_v10 = vpop.f32.mrb[9].mxu0 }
 0x1b2   : > { %v3427_v63 = vadd.f32 %v2373_v61, %v2372_v59  ;;  %v2375_v0 = vpop.f32.mrb[10].mxu1  ;;  %v2302_v13 = vadd.f32 %v2301_v10, %v2300_v8  ;;  %v2303_v14 = vpop.f32.mrb[10].mxu0 }
 0x1b3   : > { %v2376_v3 = vpop.f32.mrb[11].mxu1  ;;  %v2304_v16 = vpop.f32.mrb[11].mxu0 }
 0x1b4   : > { %v3429_v5 = vadd.f32 %v2376_v3, %v2375_v0  ;;  %v2305_v18 = vadd.f32 %v2304_v16, %v2303_v14 }
 0x1b8   : > { %v2378_v7 = vpop.f32.mrb[12].mxu1  ;;  %v2306_v20 = vpop.f32.mrb[12].mxu0 }
 0x1b9   : > { %v2379_v9 = vpop.f32.mrb[13].mxu1  ;;  %v2307_v22 = vpop.f32.mrb[13].mxu0 }
 0x1ba   : > { %v3431_v11 = vadd.f32 %v2379_v9, %v2378_v7  ;;  %v2381_v12 = vpop.f32.mrb[14].mxu1  ;;  %v3435_v25 = vadd.f32 %v2307_v22, %v2306_v20  ;;  %v2309_v26 = vpop.f32.mrb[14].mxu0 }
 0x1bb   : > { %v2382_v15 = vpop.f32.mrb[15].mxu1  ;;  %v2310_v29 = vpop.f32.mrb[15].mxu0 }
 0x1bc   : > { %v3433_v17 = vadd.f32 %v2382_v15, %v2381_v12  ;;  %v2311_v32 = vadd.f32 %v2310_v29, %v2309_v26 }
 0x1c0   : > { %v2400_v19 = vpop.f32.mrb[16].mxu1  ;;  %v2312_v37 = vpop.f32.mrb[16].mxu0 }
 0x1c1   : > { %v2401_v21 = vpop.f32.mrb[17].mxu1  ;;  %v2313_v39 = vpop.f32.mrb[17].mxu0 }
 0x1c2   : > { %v2402_v23 = vadd.f32 %v2401_v21, %v2400_v19  ;;  %v2403_v24 = vpop.f32.mrb[18].mxu1  ;;  %v3444_v45 = vadd.f32 %v2313_v39, %v2312_v37  ;;  %v2315_v47 = vpop.f32.mrb[18].mxu0 }
 0x1c3   : > { %v2404_v28 = vpop.f32.mrb[19].mxu1  ;;  %v2316_v49 = vpop.f32.mrb[19].mxu0 }
 0x1c4   : > { %v1096_v30 = vadd.f32 %v2402_v23, %v2290_v53  ;;  %v2405_v31 = vadd.f32 %v2404_v28, %v2403_v24  ;;  %v2317_v54 = vadd.f32 %v2316_v49, %v2315_v47 }
 0x1c6   : > { %v1229_v33 = vadd.f32 %v3440_v27, %v1096_v30  ;;  %v1099_v34 = vadd.f32 %v2405_v31, %v2293_v58 }
 0x1c8   : > { %v1230_v35 = vadd.f32 %v3440_v27, %v1099_v34  ;;  %v2406_v36 = vpop.f32.mrb[20].mxu1  ;;  %v1261_v40 = vmax.f32 %v1229_v33, 0.0  ;;  %v2318_v60 = vpop.f32.mrb[20].mxu0 }
 0x1c9   : > { %v2407_v38 = vpop.f32.mrb[21].mxu1  ;;  %v2319_v62 = vpop.f32.mrb[21].mxu0 }
 0x1ca   : > { %v1262_v41 = vmax.f32 %v1230_v35, 0.0  ;;  %v2408_v42 = vadd.f32 %v2407_v38, %v2406_v36  ;;  %v2409_v44 = vpop.f32.mrb[22].mxu1  ;;  %v3448_v7 = vadd.f32 %v2319_v62, %v2318_v60 }
 0x1cb   : > { %v2410_v48 = vpop.f32.mrb[23].mxu1 }
 0x1cc   : > { %v1104_v50 = vadd.f32 %v2408_v42, %v2296_v1  ;;  %v2411_v52 = vadd.f32 %v2410_v48, %v2409_v44  ;;  %v1293_v53 = vpack.c.bf16 %v1262_v41, %v1261_v40  ;;  %v2321_v1 = vpop.f32.mrb[22].mxu0 }
 0x1cd   : > { %v2322_v9 = vpop.f32.mrb[23].mxu0 }
 0x1ce   : > { %v1231_v55 = vadd.f32 %v3440_v27, %v1104_v50  ;;  %v1107_v56 = vadd.f32 %v2411_v52, %v2299_v6  ;;  %2536 = vmatprep.mubr.bf16.mxu0 %v1293_v53  ;;  %v2323_v6 = vadd.f32 %v2322_v9, %v2321_v1 }
 0x1d0   : > { %v1232_v58 = vadd.f32 %v3440_v27, %v1107_v56  ;;  %v2412_v59 = vpop.f32.mrb[24].mxu1  ;;  %v1263_v0 = vmax.f32 %v1231_v55, 0.0  ;;  %v2324_v21 = vpop.f32.mrb[24].mxu0 }
 0x1d1   : > { %v2413_v61 = vpop.f32.mrb[25].mxu1  ;;  %v2325_v23 = vpop.f32.mrb[25].mxu0 }
 0x1d2   : > { %v1264_v2 = vmax.f32 %v1232_v58, 0.0  ;;  %v2414_v3 = vadd.f32 %v2413_v61, %v2412_v59  ;;  %v2415_v4 = vpop.f32.mrb[26].mxu1  ;;  %v3452_v30 = vadd.f32 %v2325_v23, %v2324_v21  ;;  %v2327_v31 = vpop.f32.mrb[26].mxu0 }
 0x1d3   : > { %v2416_v8 = vpop.f32.mrb[27].mxu1  ;;  %v2328_v33 = vpop.f32.mrb[27].mxu0 }
 0x1d4   : > { %v1294_v10 = vpack.c.bf16 %v1264_v2, %v1263_v0  ;;  %v1112_v12 = vadd.f32 %v2414_v3, %v2302_v13  ;;  %v2417_v14 = vadd.f32 %v2416_v8, %v2415_v4  ;;  %v2329_v36 = vadd.f32 %v2328_v33, %v2327_v31 }
 0x1d6   : > { %v1233_v15 = vadd.f32 %v3440_v27, %v1112_v12  ;;  %v1115_v16 = vadd.f32 %v2417_v14, %v2305_v18  ;;  %2537 = vmatmul.mubr.bf16.vlgmr.msra.gmra.mrb[48].mxu0 %v1294_v10 }
 0x1d8   : > { %v1234_v19 = vadd.f32 %v3440_v27, %v1115_v16  ;;  %v2418_v20 = vpop.f32.mrb[28].mxu1  ;;  %v1265_v24 = vmax.f32 %v1233_v15, 0.0  ;;  %v2330_v41 = vpop.f32.mrb[28].mxu0 }
 0x1d9   : > { %v2419_v22 = vpop.f32.mrb[29].mxu1  ;;  %v2331_v44 = vpop.f32.mrb[29].mxu0 }
 0x1da   : > { %v1266_v26 = vmax.f32 %v1234_v19, 0.0  ;;  %v2420_v28 = vadd.f32 %v2419_v22, %v2418_v20  ;;  %v2421_v29 = vpop.f32.mrb[30].mxu1  ;;  %v3457_v52 = vadd.f32 %v2331_v44, %v2330_v41 }
 0x1db   : > { %v2422_v13 = vpop.f32.mrb[31].mxu1 }
 0x1dc   : > { %v1120_v34 = vadd.f32 %v2420_v28, %v3435_v25  ;;  %v2423_v35 = vadd.f32 %v2422_v13, %v2421_v29  ;;  %v1295_v18 = vpack.c.bf16 %v1266_v26, %v1265_v24  ;;  %v2333_v25 = vpop.f32.mrb[30].mxu0 }
 0x1dd   : > { %v2334_v55 = vpop.f32.mrb[31].mxu0 }
 0x1de   : > { %v1235_v37 = vadd.f32 %v3440_v27, %v1120_v34  ;;  %v1123_v38 = vadd.f32 %v2423_v35, %v2311_v32  ;;  %2540 = vmatprep.mubr.bf16.mxu0 %v1295_v18  ;;  %v2335_v59 = vadd.f32 %v2334_v55, %v2333_v25 }
 0x1e0   : > { %v1236_v39 = vadd.f32 %v3440_v27, %v1123_v38  ;;  %v2424_v40 = vpop.f32.mrb[32].mxu1  ;;  %v1267_v47 = vmax.f32 %v1235_v37, 0.0  ;;  %v2336_v2 = vpop.f32.mrb[32].mxu0 }
 0x1e1   : > { %v2425_v42 = vpop.f32.mrb[33].mxu1  ;;  %v2337_v4 = vpop.f32.mrb[33].mxu0 }
 0x1e2   : > { %v1268_v48 = vmax.f32 %v1236_v39, 0.0  ;;  %v2426_v49 = vadd.f32 %v2425_v42, %v2424_v40  ;;  %v2427_v50 = vpop.f32.mrb[34].mxu1  ;;  %v3462_v12 = vadd.f32 %v2337_v4, %v2336_v2 }
 0x1e3   : > { %v2428_v53 = vpop.f32.mrb[35].mxu1 }
 0x1e4   : > { %v1128_v56 = vadd.f32 %v2426_v49, %v3444_v45  ;;  %v2429_v58 = vadd.f32 %v2428_v53, %v2427_v50  ;;  %v1296_v32 = vpack.c.bf16 %v1268_v48, %v1267_v47  ;;  %v2339_v45 = vpop.f32.mrb[34].mxu0 }
 0x1e5   : > { %v2340_v15 = vpop.f32.mrb[35].mxu0 }
 0x1e6   : > { %v1237_v60 = vadd.f32 %v3440_v27, %v1128_v56  ;;  %v1131_v61 = vadd.f32 %v2429_v58, %v2317_v54  ;;  %2541 = vmatmul.mubr.bf16.gmra.mrb[52].mxu0 %v1296_v32  ;;  %v2341_v20 = vadd.f32 %v2340_v15, %v2339_v45 }
 0x1e8   : > { %v1238_v62 = vadd.f32 %v3440_v27, %v1131_v61  ;;  %v2430_v0 = vpop.f32.mrb[36].mxu1  ;;  %v1269_v1 = vmax.f32 %v1237_v60, 0.0  ;;  %v2342_v26 = vpop.f32.mrb[36].mxu0 }
 0x1e9   : > { %v2431_v3 = vpop.f32.mrb[37].mxu1  ;;  %v2343_v29 = vpop.f32.mrb[37].mxu0 }
 0x1ea   : > { %v1270_v8 = vmax.f32 %v1238_v62, 0.0  ;;  %v2432_v9 = vadd.f32 %v2431_v3, %v2430_v0  ;;  %v2433_v10 = vpop.f32.mrb[38].mxu1  ;;  %v2344_v35 = vadd.f32 %v2343_v29, %v2342_v26  ;;  %v2345_v18 = vpop.f32.mrb[38].mxu0 }
 0x1eb   : > { %v2434_v14 = vpop.f32.mrb[39].mxu1  ;;  %v2346_v37 = vpop.f32.mrb[39].mxu0 }
 0x1ec   : > { %v1136_v16 = vadd.f32 %v2432_v9, %v3448_v7  ;;  %v2435_v19 = vadd.f32 %v2434_v14, %v2433_v10  ;;  %v1297_v54 = vpack.c.bf16 %v1270_v8, %v1269_v1 }
 0x1ee   : > { %v1239_v21 = vadd.f32 %v3440_v27, %v1136_v16  ;;  %v1139_v22 = vadd.f32 %v2435_v19, %v2323_v6  ;;  %2544 = vmatprep.mubr.bf16.mxu0 %v1297_v54  ;;  %v2347_v6 = vadd.f32 %v2346_v37, %v2345_v18 }
 0x1f0   : > { %v1240_v23 = vadd.f32 %v3440_v27, %v1139_v22  ;;  %v2436_v24 = vpop.f32.mrb[40].mxu1  ;;  %v1271_v31 = vmax.f32 %v1239_v21, 0.0  ;;  %v2348_v48 = vpop.f32.mrb[40].mxu0 }
 0x1f1   : > { %v2437_v28 = vpop.f32.mrb[41].mxu1  ;;  %v2349_v50 = vpop.f32.mrb[41].mxu0 }
 0x1f2   : > { %v1272_v13 = vmax.f32 %v1240_v23, 0.0  ;;  %v2438_v33 = vadd.f32 %v2437_v28, %v2436_v24  ;;  %v2439_v34 = vpop.f32.mrb[42].mxu1  ;;  %v2350_v58 = vadd.f32 %v2349_v50, %v2348_v48  ;;  %v2351_v32 = vpop.f32.mrb[42].mxu0 }
 0x1f3   : > { %v2440_v7 = vpop.f32.mrb[43].mxu1  ;;  %v2352_v60 = vpop.f32.mrb[43].mxu0 }
 0x1f4   : > { %v1144_v38 = vadd.f32 %v2438_v33, %v3452_v30  ;;  %v2441_v39 = vadd.f32 %v2440_v7, %v2439_v34  ;;  %v1298_v40 = vpack.c.bf16 %v1272_v13, %v1271_v31 }
 0x1f6   : > { %v1241_v41 = vadd.f32 %v3440_v27, %v1144_v38  ;;  %v1147_v42 = vadd.f32 %v2441_v39, %v2329_v36  ;;  %2545 = vmatmul.mubr.bf16.gmra.mrb[56].mxu0 %v1298_v40  ;;  %v2353_v36 = vadd.f32 %v2352_v60, %v2351_v32 }
 0x1f8   : > { %v1242_v44 = vadd.f32 %v3440_v27, %v1147_v42  ;;  %v2442_v47 = vpop.f32.mrb[44].mxu1  ;;  %v1273_v25 = vmax.f32 %v1241_v41, 0.0  ;;  %v2354_v8 = vpop.f32.mrb[44].mxu0 }
 0x1f9   : > { %v2443_v49 = vpop.f32.mrb[45].mxu1  ;;  %v2355_v10 = vpop.f32.mrb[45].mxu0 }
 0x1fa   : > { %v1274_v53 = vmax.f32 %v1242_v44, 0.0  ;;  %v2444_v55 = vadd.f32 %v2443_v49, %v2442_v47  ;;  %v2445_v56 = vpop.f32.mrb[46].mxu1  ;;  %v2356_v19 = vadd.f32 %v2355_v10, %v2354_v8  ;;  %v2357_v54 = vpop.f32.mrb[46].mxu0 }
 0x1fb   : > { %v2446_v30 = vpop.f32.mrb[47].mxu1  ;;  %v2358_v21 = vpop.f32.mrb[47].mxu0 }
 0x1fc   : > { %v1152_v61 = vadd.f32 %v2444_v55, %v3457_v52  ;;  %v2447_v62 = vadd.f32 %v2446_v30, %v2445_v56  ;;  %v1299_v0 = vpack.c.bf16 %v1274_v53, %v1273_v25 }
 0x1fe   : > { %v1243_v2 = vadd.f32 %v3440_v27, %v1152_v61  ;;  %v1155_v3 = vadd.f32 %v2447_v62, %v2335_v59  ;;  %2548 = vmatprep.mubr.bf16.mxu0 %v1299_v0  ;;  %v2359_v59 = vadd.f32 %v2358_v21, %v2357_v54 }
 0x200   : > { %v1244_v4 = vadd.f32 %v3440_v27, %v1155_v3  ;;  %v2448_v1 = vpop.f32.mrb[48].mxu1  ;;  %v1275_v45 = vmax.f32 %v1243_v2, 0.0 }
 0x201   : > { %v2449_v9 = vpop.f32.mrb[49].mxu1 }
 0x202   : > { %v1276_v14 = vmax.f32 %v1244_v4, 0.0  ;;  %v2450_v15 = vadd.f32 %v2449_v9, %v2448_v1  ;;  %v2451_v16 = vpop.f32.mrb[50].mxu1 }
 0x203   : > { %v2452_v52 = vpop.f32.mrb[51].mxu1 }
 0x204   : > { %v1160_v22 = vadd.f32 %v2450_v15, %v3462_v12  ;;  %v2453_v23 = vadd.f32 %v2452_v52, %v2451_v16  ;;  %v1300_v24 = vpack.c.bf16 %v1276_v14, %v1275_v45 }
 0x206   : > { %v1245_v26 = vadd.f32 %v3440_v27, %v1160_v22  ;;  %v1163_v28 = vadd.f32 %v2453_v23, %v2341_v20  ;;  %2549 = vmatmul.mubr.bf16.gmra.mrb[60].mxu0 %v1300_v24 }
 0x208   : > { %v1246_v29 = vadd.f32 %v3440_v27, %v1163_v28  ;;  %v2454_v31 = vpop.f32.mrb[52].mxu1  ;;  %v1277_v33 = vmax.f32 %v1245_v26, 0.0 }
 0x209   : > { %v2455_v13 = vpop.f32.mrb[53].mxu1 }
 0x20a   : > { %v1278_v34 = vmax.f32 %v1246_v29, 0.0  ;;  %v2456_v18 = vadd.f32 %v2455_v13, %v2454_v31  ;;  %v2457_v7 = vpop.f32.mrb[54].mxu1 }
 0x20b   : > { %v2458_v37 = vpop.f32.mrb[55].mxu1 }
 0x20c   : > { %v1168_v38 = vadd.f32 %v2456_v18, %v2344_v35  ;;  %v2459_v39 = vadd.f32 %v2458_v37, %v2457_v7  ;;  %v1301_v40 = vpack.c.bf16 %v1278_v34, %v1277_v33 }
 0x20e   : > { %v1247_v12 = vadd.f32 %v3440_v27, %v1168_v38  ;;  %v1171_v41 = vadd.f32 %v2459_v39, %v2347_v6  ;;  %2552 = vmatprep.mubr.bf16.mxu0 %v1301_v40 }
 0x210   : > { %v1248_v42 = vadd.f32 %v3440_v27, %v1171_v41  ;;  %v2460_v20 = vpop.f32.mrb[56].mxu1  ;;  %v1279_v47 = vmax.f32 %v1247_v12, 0.0 }
 0x211   : > { %v2461_v44 = vpop.f32.mrb[57].mxu1 }
 0x212   : > { %v1280_v48 = vmax.f32 %v1248_v42, 0.0  ;;  %v2462_v49 = vadd.f32 %v2461_v44, %v2460_v20  ;;  %v2463_v50 = vpop.f32.mrb[58].mxu1 }
 0x213   : > { %v2464_v25 = vpop.f32.mrb[59].mxu1 }
 0x214   : > { %v1176_v53 = vadd.f32 %v2462_v49, %v2350_v58  ;;  %v2465_v55 = vadd.f32 %v2464_v25, %v2463_v50  ;;  %v1302_v56 = vpack.c.bf16 %v1280_v48, %v1279_v47 }
 0x216   : > { %v1249_v35 = vadd.f32 %v3440_v27, %v1176_v53  ;;  %v1179_v32 = vadd.f32 %v2465_v55, %v2353_v36  ;;  %2553 = vmatmul.mubr.bf16.gmra.mrb[64].mxu0 %v1302_v56 }
 0x218   : > { %v1250_v30 = vadd.f32 %v3440_v27, %v1179_v32  ;;  %v2466_v6 = vpop.f32.mrb[60].mxu1  ;;  %v1281_v61 = vmax.f32 %v1249_v35, 0.0 }
 0x219   : > { %v2467_v60 = vpop.f32.mrb[61].mxu1 }
 0x21a   : > { %v1282_v62 = vmax.f32 %v1250_v30, 0.0  ;;  %v2468_v0 = vadd.f32 %v2467_v60, %v2466_v6  ;;  %v2469_v2 = vpop.f32.mrb[62].mxu1 }
 0x21b   : > { %v2470_v3 = vpop.f32.mrb[63].mxu1 }
 0x21c   : > { %v1184_v4 = vadd.f32 %v2468_v0, %v2356_v19  ;;  %v2471_v1 = vadd.f32 %v2470_v3, %v2469_v2  ;;  %v1303_v8 = vpack.c.bf16 %v1282_v62, %v1281_v61 }
 0x21e   : > { %v1251_v58 = vadd.f32 %v3440_v27, %v1184_v4  ;;  %v1187_v9 = vadd.f32 %v2471_v1, %v2359_v59  ;;  %2556 = vmatprep.mubr.bf16.mxu0 %v1303_v8  ;;  %v3501_v4 = vld [vmem:[%s3853_s6] ss:$0 sm:$0xff] }
 0x220   : > { %v1252_v10 = vadd.f32 %v3440_v27, %v1187_v9  ;;  %v2472_v36 = vpop.f32.mrb[64].mxu1  ;;  %v1283_v14 = vmax.f32 %v1251_v58, 0.0 }
 0x221   : > { %v2473_v45 = vpop.f32.mrb[65].mxu1 }
 0x222   : > { %v1284_v15 = vmax.f32 %v1252_v10, 0.0  ;;  %v2474_v16 = vadd.f32 %v2473_v45, %v2472_v36  ;;  %v2475_v54 = vpop.f32.mrb[66].mxu1 }
 0x223   : > { %v2476_v52 = vpop.f32.mrb[67].mxu1 }
 0x224   : > { %v1192_v21 = vadd.f32 %v2474_v16, %v3419_v43  ;;  %v2477_v22 = vadd.f32 %v2476_v52, %v2475_v54  ;;  %v1304_v23 = vpack.c.bf16 %v1284_v15, %v1283_v14 }
 0x226   : > { %v1253_v19 = vadd.f32 %v3440_v27, %v1192_v21  ;;  %v1195_v24 = vadd.f32 %v2477_v22, %v3421_v46  ;;  %2557 = vmatmul.mubr.bf16.gmra.mrb[68].mxu0 %v1304_v23 }
 0x228   : > { %v1254_v59 = vadd.f32 %v3440_v27, %v1195_v24  ;;  %v2478_v26 = vpop.f32.mrb[68].mxu1  ;;  %v1285_v29 = vmax.f32 %v1253_v19, 0.0 }
 0x229   : > { %v2479_v28 = vpop.f32.mrb[69].mxu1 }
 0x22a   : > { %v1286_v31 = vmax.f32 %v1254_v59, 0.0  ;;  %v2480_v13 = vadd.f32 %v2479_v28, %v2478_v26  ;;  %v2481_v33 = vpop.f32.mrb[70].mxu1 }
 0x22b   : > { %v2482_v34 = vpop.f32.mrb[71].mxu1 }
 0x22c   : > { %v1200_v18 = vadd.f32 %v2480_v13, %v3423_v51  ;;  %v2483_v7 = vadd.f32 %v2482_v34, %v2481_v33  ;;  %v1305_v43 = vpack.c.bf16 %v1286_v31, %v1285_v29 }
 0x22e   : > { %v1255_v37 = vadd.f32 %v3440_v27, %v1200_v18  ;;  %v1203_v38 = vadd.f32 %v2483_v7, %v3425_v57  ;;  %2560 = vmatprep.mubr.bf16.mxu0 %v1305_v43 }
 0x230   : > { %v1256_v46 = vadd.f32 %v3440_v27, %v1203_v38  ;;  %v2484_v39 = vpop.f32.mrb[72].mxu1  ;;  %v1287_v12 = vmax.f32 %v1255_v37, 0.0 }
 0x231   : > { %v2485_v40 = vpop.f32.mrb[73].mxu1 }
 0x232   : > { %v1288_v41 = vmax.f32 %v1256_v46, 0.0  ;;  %v2486_v42 = vadd.f32 %v2485_v40, %v2484_v39  ;;  %v2487_v20 = vpop.f32.mrb[74].mxu1 }
 0x233   : > { %v2488_v44 = vpop.f32.mrb[75].mxu1 }
 0x234   : > { %v1208_v47 = vadd.f32 %v2486_v42, %v3427_v63  ;;  %v2489_v48 = vadd.f32 %v2488_v44, %v2487_v20  ;;  %v1306_v51 = vpack.c.bf16 %v1288_v41, %v1287_v12 }
 0x236   : > { %v1257_v49 = vadd.f32 %v3440_v27, %v1208_v47  ;;  %v1211_v50 = vadd.f32 %v2489_v48, %v3429_v5  ;;  %2561 = vmatmul.mubr.bf16.gmra.mrb[72].mxu0 %v1306_v51 }
 0x238   : > { %v1258_v57 = vadd.f32 %v3440_v27, %v1211_v50  ;;  %v2490_v25 = vpop.f32.mrb[76].mxu1  ;;  %v1289_v55 = vmax.f32 %v1257_v49, 0.0 }
 0x239   : > { %v2491_v53 = vpop.f32.mrb[77].mxu1 }
 0x23a   : > { %v1290_v56 = vmax.f32 %v1258_v57, 0.0  ;;  %v2492_v35 = vadd.f32 %v2491_v53, %v2490_v25  ;;  %v2493_v32 = vpop.f32.mrb[78].mxu1 }
 0x23b   : > { %v2494_v30 = vpop.f32.mrb[79].mxu1 }
 0x23c   : > { %v1216_v6 = vadd.f32 %v2492_v35, %v3431_v11  ;;  %v2495_v60 = vadd.f32 %v2494_v30, %v2493_v32  ;;  %v1307_v63 = vpack.c.bf16 %v1290_v56, %v1289_v55 }
 0x23e   : > { %v1259_v61 = vadd.f32 %v3440_v27, %v1216_v6  ;;  %v1219_v62 = vadd.f32 %v2495_v60, %v3433_v17  ;;  %2564 = vmatprep.mubr.bf16.mxu0 %v1307_v63  ;;  %v3508_v17 = vld [vmem:[%s3854_s7] ss:$0 sm:$0xff] }
 0x240   : > { %v1260_v5 = vadd.f32 %v3440_v27, %v1219_v62  ;;  %v1291_v0 = vmax.f32 %v1259_v61, 0.0 }
 0x242   : > { %v1292_v2 = vmax.f32 %v1260_v5, 0.0 }
 0x244   : > { %v1308_v3 = vpack.c.bf16 %v1292_v2, %v1291_v0 }
 0x246   : > { %2565 = vmatmul.mubr.bf16.gmra.mrb[76].mxu0 %v1308_v3 }
 0x2a9   : > { %v2538_v1 = vpop.f32.mrb[48].mxu0 }
 0x2aa   : > { %v1423_v11 = vadd.f32 %v2538_v1, %v3501_v4  ;;  %v1414_v8 = vpop.f32.mrb[49].mxu0 }
 0x2ab   : > { %v1415_v58 = vadd.f32 %v3501_v4, %v1414_v8  ;;  %v2539_v9 = vpop.f32.mrb[50].mxu0 }
 0x2ac   : > { %v1543_v27 = vmax.f32 %v1423_v11, 0.0  ;;  %v1426_v10 = vadd.f32 %v2539_v9, %v3501_v4  ;;  %v1417_v36 = vpop.f32.mrb[51].mxu0 }
 0x2ad   : > { %v1541_v45 = vmax.f32 %v1415_v58, 0.0  ;;  %v1418_v14 = vadd.f32 %v3501_v4, %v1417_v36 }
 0x2ae   : > { %v1544_v15 = vmax.f32 %v1426_v10, 0.0  ;;  %v1582_v16 = vmul.f32 %v3508_v17, %v1543_v27 }
 0x2af   : > { %v1542_v54 = vmax.f32 %v1418_v14, 0.0  ;;  %v1580_v52 = vmul.f32 %v3508_v17, %v1541_v45 }
 0x2b0   : > { %v1619_v21 = vsel %vm1612_vm0, %v1582_v16, 0.0  ;;  %v1583_v22 = vmul.f32 %v3508_v17, %v1544_v15 }
 0x2b1   : > { %1620 = vadd.xlane.f32.xlu1 %v1619_v21  ;;  %v1613_v23 = vsel %vm1612_vm0, %v1580_v52, 0.0  ;;  %v1581_v19 = vmul.f32 %v3508_v17, %v1542_v54 }
 0x2b2   : > { %1614 = vadd.xlane.f32.xlu0 %v1613_v23  ;;  %v1622_v24 = vsel %vm1612_vm0, %v1583_v22, 0.0 }
 0x2b3   : > { %v1616_v59 = vsel %vm1612_vm0, %v1581_v19, 0.0 }
 0x2b5   : > { %1623 = vadd.xlane.f32.xlu1 %v1622_v24 }
 0x2b6   : > { %1617 = vadd.xlane.f32.xlu0 %v1616_v59 }
 0x2b9   : > { %v2542_v26 = vpop.f32.mrb[52].mxu0 }
 0x2ba   : > { %v1439_v28 = vadd.f32 %v2542_v26, %v3501_v4  ;;  %v1430_v29 = vpop.f32.mrb[53].mxu0 }
 0x2bb   : > { %v1431_v31 = vadd.f32 %v3501_v4, %v1430_v29  ;;  %v2543_v13 = vpop.f32.mrb[54].mxu0 }
 0x2bc   : > { %v1547_v33 = vmax.f32 %v1439_v28, 0.0  ;;  %v1442_v34 = vadd.f32 %v2543_v13, %v3501_v4  ;;  %v1433_v18 = vpop.f32.mrb[55].mxu0 }
 0x2bd   : > { %v1545_v7 = vmax.f32 %v1431_v31, 0.0  ;;  %v1434_v43 = vadd.f32 %v3501_v4, %v1433_v18 }
 0x2be   : > { %v1548_v37 = vmax.f32 %v1442_v34, 0.0  ;;  %v1586_v38 = vmul.f32 %v3508_v17, %v1547_v33 }
 0x2bf   : > { %v1546_v46 = vmax.f32 %v1434_v43, 0.0  ;;  %v1584_v12 = vmul.f32 %v3508_v17, %v1545_v7 }
 0x2c0   : > { %v1631_v39 = vsel %vm1612_vm0, %v1586_v38, 0.0  ;;  %v1587_v40 = vmul.f32 %v3508_v17, %v1548_v37 }
 0x2c1   : > { %1632 = vadd.xlane.f32.xlu0 %v1631_v39  ;;  %v1585_v42 = vmul.f32 %v3508_v17, %v1546_v46  ;;  %v1625_v20 = vsel %vm1612_vm0, %v1584_v12, 0.0 }
 0x2c2   : > { %v1634_v41 = vsel %vm1612_vm0, %v1587_v40, 0.0 }
 0x2c3   : > { %1635 = vadd.xlane.f32.xlu1 %v1634_v41  ;;  %v1628_v44 = vsel %vm1612_vm0, %v1585_v42, 0.0 }
 0x2c5   : > { %1626 = vadd.xlane.f32.xlu0 %v1625_v20 }
 0x2c7   : > { %1629 = vadd.xlane.f32.xlu1 %v1628_v44 }
 0x2c9   : > { %v2546_v47 = vpop.f32.mrb[56].mxu0 }
 0x2ca   : > { %v1455_v48 = vadd.f32 %v2546_v47, %v3501_v4  ;;  %v1446_v51 = vpop.f32.mrb[57].mxu0 }
 0x2cb   : > { %v1447_v49 = vadd.f32 %v3501_v4, %v1446_v51  ;;  %v2547_v50 = vpop.f32.mrb[58].mxu0 }
 0x2cc   : > { %v1551_v57 = vmax.f32 %v1455_v48, 0.0  ;;  %v1458_v25 = vadd.f32 %v2547_v50, %v3501_v4  ;;  %v1449_v53 = vpop.f32.mrb[59].mxu0 }
 0x2cd   : > { %v1549_v55 = vmax.f32 %v1447_v49, 0.0  ;;  %v1450_v56 = vadd.f32 %v3501_v4, %v1449_v53 }
 0x2ce   : > { %v1552_v35 = vmax.f32 %v1458_v25, 0.0  ;;  %v1590_v32 = vmul.f32 %v3508_v17, %v1551_v57 }
 0x2cf   : > { %v1550_v30 = vmax.f32 %v1450_v56, 0.0  ;;  %v1588_v63 = vmul.f32 %v3508_v17, %v1549_v55 }
 0x2d0   : > { %v1643_v6 = vsel %vm1612_vm0, %v1590_v32, 0.0  ;;  %v1591_v60 = vmul.f32 %v3508_v17, %v1552_v35 }
 0x2d1   : > { %1644 = vadd.xlane.f32.xlu0 %v1643_v6  ;;  %v1589_v62 = vmul.f32 %v3508_v17, %v1550_v30  ;;  %v1637_v5 = vsel %vm1612_vm0, %v1588_v63, 0.0 }
 0x2d2   : > { %v1646_v61 = vsel %vm1612_vm0, %v1591_v60, 0.0 }
 0x2d3   : > { %1647 = vadd.xlane.f32.xlu1 %v1646_v61  ;;  %v1640_v0 = vsel %vm1612_vm0, %v1589_v62, 0.0 }
 0x2d5   : > { %1638 = vadd.xlane.f32.xlu0 %v1637_v5 }
 0x2d7   : > { %1641 = vadd.xlane.f32.xlu1 %v1640_v0 }
 0x2d9   : > { %v2550_v2 = vpop.f32.mrb[60].mxu0 }
 0x2da   : > { %v1471_v3 = vadd.f32 %v2550_v2, %v3501_v4  ;;  %v1462_v1 = vpop.f32.mrb[61].mxu0 }
 0x2db   : > { %v1463_v11 = vadd.f32 %v3501_v4, %v1462_v1  ;;  %v2551_v8 = vpop.f32.mrb[62].mxu0 }
 0x2dc   : > { %v1555_v58 = vmax.f32 %v1471_v3, 0.0  ;;  %v1474_v9 = vadd.f32 %v2551_v8, %v3501_v4  ;;  %v1465_v27 = vpop.f32.mrb[63].mxu0 }
 0x2dd   : > { %v1553_v10 = vmax.f32 %v1463_v11, 0.0  ;;  %v1466_v36 = vadd.f32 %v3501_v4, %v1465_v27 }
 0x2de   : > { %v1556_v45 = vmax.f32 %v1474_v9, 0.0  ;;  %v1594_v14 = vmul.f32 %v3508_v17, %v1555_v58 }
 0x2df   : > { %v1554_v15 = vmax.f32 %v1466_v36, 0.0  ;;  %v1592_v52 = vmul.f32 %v3508_v17, %v1553_v10 }
 0x2e0   : > { %v1655_v16 = vsel %vm1612_vm0, %v1594_v14, 0.0  ;;  %v1595_v54 = vmul.f32 %v3508_v17, %v1556_v45 }
 0x2e1   : > { %1656 = vadd.xlane.f32.xlu0 %v1655_v16  ;;  %v1593_v22 = vmul.f32 %v3508_v17, %v1554_v15  ;;  %v1649_v23 = vsel %vm1612_vm0, %v1592_v52, 0.0 }
 0x2e2   : > { %v1658_v21 = vsel %vm1612_vm0, %v1595_v54, 0.0 }
 0x2e3   : > { %1659 = vadd.xlane.f32.xlu1 %v1658_v21  ;;  %v1652_v19 = vsel %vm1612_vm0, %v1593_v22, 0.0 }
 0x2e5   : > { %1650 = vadd.xlane.f32.xlu0 %v1649_v23 }
 0x2e7   : > { %1653 = vadd.xlane.f32.xlu1 %v1652_v19 }
 0x2e9   : > { %v2554_v24 = vpop.f32.mrb[64].mxu0 }
 0x2ea   : > { %v1487_v59 = vadd.f32 %v2554_v24, %v3501_v4  ;;  %v1478_v26 = vpop.f32.mrb[65].mxu0 }
 0x2eb   : > { %v1479_v28 = vadd.f32 %v3501_v4, %v1478_v26  ;;  %v2555_v29 = vpop.f32.mrb[66].mxu0 }
 0x2ec   : > { %v1559_v31 = vmax.f32 %v1487_v59, 0.0  ;;  %v1490_v13 = vadd.f32 %v2555_v29, %v3501_v4  ;;  %v1481_v33 = vpop.f32.mrb[67].mxu0 }
 0x2ed   : > { %v1557_v34 = vmax.f32 %v1479_v28, 0.0  ;;  %v1482_v18 = vadd.f32 %v3501_v4, %v1481_v33 }
 0x2ee   : > { %v1560_v7 = vmax.f32 %v1490_v13, 0.0  ;;  %v1598_v43 = vmul.f32 %v3508_v17, %v1559_v31 }
 0x2ef   : > { %v1558_v37 = vmax.f32 %v1482_v18, 0.0  ;;  %v1596_v39 = vmul.f32 %v3508_v17, %v1557_v34 }
 0x2f0   : > { %v1667_v38 = vsel %vm1612_vm0, %v1598_v43, 0.0  ;;  %v1599_v46 = vmul.f32 %v3508_v17, %v1560_v7 }
 0x2f1   : > { %1668 = vadd.xlane.f32.xlu0 %v1667_v38  ;;  %v1597_v12 = vmul.f32 %v3508_v17, %v1558_v37  ;;  %v1661_v41 = vsel %vm1612_vm0, %v1596_v39, 0.0 }
 0x2f2   : > { %v1670_v40 = vsel %vm1612_vm0, %v1599_v46, 0.0 }
 0x2f3   : > { %1671 = vadd.xlane.f32.xlu1 %v1670_v40  ;;  %v1664_v42 = vsel %vm1612_vm0, %v1597_v12, 0.0  ;;  %v3605_v12 = vld [vmem:[#allocation2] ss:$0 sm:$0xff] }
 0x2f5   : > { %1662 = vadd.xlane.f32.xlu0 %v1661_v41 }
 0x2f7   : > { %1665 = vadd.xlane.f32.xlu1 %v1664_v42 }
 0x2f9   : > { %v2558_v20 = vpop.f32.mrb[68].mxu0 }
 0x2fa   : > { %v1503_v44 = vadd.f32 %v2558_v20, %v3501_v4  ;;  %v1494_v47 = vpop.f32.mrb[69].mxu0 }
 0x2fb   : > { %v1495_v48 = vadd.f32 %v3501_v4, %v1494_v47  ;;  %v2559_v51 = vpop.f32.mrb[70].mxu0 }
 0x2fc   : > { %v1563_v49 = vmax.f32 %v1503_v44, 0.0  ;;  %v1506_v50 = vadd.f32 %v2559_v51, %v3501_v4  ;;  %v1497_v57 = vpop.f32.mrb[71].mxu0 }
 0x2fd   : > { %v1561_v25 = vmax.f32 %v1495_v48, 0.0  ;;  %v1498_v53 = vadd.f32 %v3501_v4, %v1497_v57 }
 0x2fe   : > { %v1564_v55 = vmax.f32 %v1506_v50, 0.0  ;;  %v1602_v56 = vmul.f32 %v3508_v17, %v1563_v49 }
 0x2ff   : > { %v1562_v35 = vmax.f32 %v1498_v53, 0.0  ;;  %v1600_v6 = vmul.f32 %v3508_v17, %v1561_v25 }
 0x300   : > { %v1679_v32 = vsel %vm1612_vm0, %v1602_v56, 0.0  ;;  %v1603_v30 = vmul.f32 %v3508_v17, %v1564_v55 }
 0x301   : > { %1680 = vadd.xlane.f32.xlu0 %v1679_v32  ;;  %v1601_v63 = vmul.f32 %v3508_v17, %v1562_v35  ;;  %v1673_v61 = vsel %vm1612_vm0, %v1600_v6, 0.0 }
 0x302   : > { %v1682_v60 = vsel %vm1612_vm0, %v1603_v30, 0.0 }
 0x303   : > { %1683 = vadd.xlane.f32.xlu1 %v1682_v60  ;;  %v1676_v62 = vsel %vm1612_vm0, %v1601_v63, 0.0 }
 0x305   : > { %1674 = vadd.xlane.f32.xlu0 %v1673_v61 }
 0x307   : > { %1677 = vadd.xlane.f32.xlu1 %v1676_v62 }
 0x309   : > { %v2562_v5 = vpop.f32.mrb[72].mxu0 }
 0x30a   : > { %v1519_v0 = vadd.f32 %v2562_v5, %v3501_v4  ;;  %v1510_v2 = vpop.f32.mrb[73].mxu0 }
 0x30b   : > { %v1511_v3 = vadd.f32 %v3501_v4, %v1510_v2  ;;  %v2563_v1 = vpop.f32.mrb[74].mxu0 }
 0x30c   : > { %v1567_v11 = vmax.f32 %v1519_v0, 0.0  ;;  %v1522_v8 = vadd.f32 %v2563_v1, %v3501_v4  ;;  %v1513_v58 = vpop.f32.mrb[75].mxu0 }
 0x30d   : > { %v1565_v9 = vmax.f32 %v1511_v3, 0.0  ;;  %v1514_v27 = vadd.f32 %v3501_v4, %v1513_v58 }
 0x30e   : > { %v1568_v10 = vmax.f32 %v1522_v8, 0.0  ;;  %v1606_v36 = vmul.f32 %v3508_v17, %v1567_v11 }
 0x30f   : > { %v1566_v45 = vmax.f32 %v1514_v27, 0.0  ;;  %v1604_v16 = vmul.f32 %v3508_v17, %v1565_v9 }
 0x310   : > { %v1691_v14 = vsel %vm1612_vm0, %v1606_v36, 0.0  ;;  %v1607_v15 = vmul.f32 %v3508_v17, %v1568_v10 }
 0x311   : > { %1692 = vadd.xlane.f32.xlu0 %v1691_v14  ;;  %v1605_v52 = vmul.f32 %v3508_v17, %v1566_v45  ;;  %v1685_v21 = vsel %vm1612_vm0, %v1604_v16, 0.0 }
 0x312   : > { %v1694_v54 = vsel %vm1612_vm0, %v1607_v15, 0.0 }
 0x313   : > { %1695 = vadd.xlane.f32.xlu1 %v1694_v54  ;;  %v1688_v22 = vsel %vm1612_vm0, %v1605_v52, 0.0 }
 0x315   : > { %1686 = vadd.xlane.f32.xlu0 %v1685_v21 }
 0x317   : > { %1689 = vadd.xlane.f32.xlu1 %v1688_v22 }
 0x319   : > { %v2566_v23 = vpop.f32.mrb[76].mxu0 }
 0x31a   : > { %v1535_v19 = vadd.f32 %v2566_v23, %v3501_v4  ;;  %v1526_v24 = vpop.f32.mrb[77].mxu0 }
 0x31b   : > { %v1527_v59 = vadd.f32 %v3501_v4, %v1526_v24  ;;  %v2567_v26 = vpop.f32.mrb[78].mxu0 }
 0x31c   : > { %v1538_v28 = vadd.f32 %v2567_v26, %v3501_v4  ;;  %v1529_v29 = vpop.f32.mrb[79].mxu0  ;;  %v1571_v31 = vmax.f32 %v1535_v19, 0.0 }
 0x31d   : > { %v1569_v13 = vmax.f32 %v1527_v59, 0.0  ;;  %v1530_v33 = vadd.f32 %v3501_v4, %v1529_v29 }
 0x31e   : > { %v1572_v34 = vmax.f32 %v1538_v28, 0.0  ;;  %v1610_v38 = vmul.f32 %v3508_v17, %v1571_v31 }
 0x31f   : > { %v1570_v18 = vmax.f32 %v1530_v33, 0.0  ;;  %v1608_v7 = vmul.f32 %v3508_v17, %v1569_v13 }
 0x320   : > { %v1611_v39 = vmul.f32 %v3508_v17, %v1572_v34  ;;  %v1703_v40 = vsel %vm1612_vm0, %v1610_v38, 0.0 }
 0x321   : > { %v1697_v43 = vsel %vm1612_vm0, %v1608_v7, 0.0  ;;  %v1609_v37 = vmul.f32 %v3508_v17, %v1570_v18 }
 0x322   : > { %1698 = vadd.xlane.f32.xlu0 %v1697_v43  ;;  %v1706_v4 = vsel %vm1612_vm0, %v1611_v39, 0.0 }
 0x323   : > { %v1700_v46 = vsel %vm1612_vm0, %v1609_v37, 0.0 }
 0x324   : > { %1701 = vadd.xlane.f32.xlu1 %v1700_v46 }
 0x326   : > { %1704 = vadd.xlane.f32.xlu0 %v1703_v40 }
 0x328   : > { %1707 = vadd.xlane.f32.xlu1 %v1706_v4 }
 0x33e   : > { %v1621_v41 = vpop.xlane.xlu1 %1620 }
 0x33f   : > { %v1718_v42 = vadd.f32 %v3605_v12, %v1621_v41  ;;  %v1615_v20 = vpop.xlane.xlu0 %1614 }
 0x340   : > { %v1716_v44 = vadd.f32 %v3605_v12, %v1615_v20 }
 0x341   : > { %1751 = vst.msk [vmem:[%s3609_s28 + $0x10] sm:$0xff] %vm1748_vm1, %v1718_v42 }
 0x342   : > { %1749 = vst.msk [vmem:[%s3609_s28] sm:$0xff] %vm1748_vm1, %v1716_v44  ;;  %v1624_v17 = vpop.xlane.xlu1 %1623 }
 0x343   : > { %v1719_v47 = vadd.f32 %v3605_v12, %v1624_v17  ;;  %v1618_v48 = vpop.xlane.xlu0 %1617 }
 0x344   : > { %v1717_v51 = vadd.f32 %v3605_v12, %v1618_v48 }
 0x345   : > { %1752 = vst.msk [vmem:[%s3609_s28 + $0x18] sm:$0xff] %vm1748_vm1, %v1719_v47 }
 0x346   : > { %1750 = vst.msk [vmem:[%s3609_s28 + $0x8] sm:$0xff] %vm1748_vm1, %v1717_v51 }
 0x34e   : > { %v1633_v49 = vpop.xlane.xlu0 %1632 }
 0x34f   : > { %v1722_v50 = vadd.f32 %v3605_v12, %v1633_v49 }
 0x350   : > { %v1636_v57 = vpop.xlane.xlu1 %1635 }
 0x351   : > { %1755 = vst.msk [vmem:[%s3609_s28 + $0x30] sm:$0xff] %vm1748_vm1, %v1722_v50  ;;  %v1723_v25 = vadd.f32 %v3605_v12, %v1636_v57 }
 0x352   : > { %v1627_v53 = vpop.xlane.xlu0 %1626 }
 0x353   : > { %1756 = vst.msk [vmem:[%s3609_s28 + $0x38] sm:$0xff] %vm1748_vm1, %v1723_v25  ;;  %v1720_v55 = vadd.f32 %v3605_v12, %v1627_v53 }
 0x354   : > { %v1630_v56 = vpop.xlane.xlu1 %1629 }
 0x355   : > { %1753 = vst.msk [vmem:[%s3609_s28 + $0x20] sm:$0xff] %vm1748_vm1, %v1720_v55  ;;  %v1721_v35 = vadd.f32 %v3605_v12, %v1630_v56 }
 0x357   : > { %1754 = vst.msk [vmem:[%s3609_s28 + $0x28] sm:$0xff] %vm1748_vm1, %v1721_v35 }
 0x35e   : > { %v1645_v32 = vpop.xlane.xlu0 %1644 }
 0x35f   : > { %v1726_v30 = vadd.f32 %v3605_v12, %v1645_v32 }
 0x360   : > { %v1648_v6 = vpop.xlane.xlu1 %1647 }
 0x361   : > { %1759 = vst.msk [vmem:[%s3609_s28 + $0x50] sm:$0xff] %vm1748_vm1, %v1726_v30  ;;  %v1727_v60 = vadd.f32 %v3605_v12, %v1648_v6 }
 0x362   : > { %v1639_v63 = vpop.xlane.xlu0 %1638 }
 0x363   : > { %1760 = vst.msk [vmem:[%s3609_s28 + $0x58] sm:$0xff] %vm1748_vm1, %v1727_v60  ;;  %v1724_v61 = vadd.f32 %v3605_v12, %v1639_v63 }
 0x364   : > { %v1642_v62 = vpop.xlane.xlu1 %1641 }
 0x365   : > { %1757 = vst.msk [vmem:[%s3609_s28 + $0x40] sm:$0xff] %vm1748_vm1, %v1724_v61  ;;  %v1725_v5 = vadd.f32 %v3605_v12, %v1642_v62 }
 0x367   : > { %1758 = vst.msk [vmem:[%s3609_s28 + $0x48] sm:$0xff] %vm1748_vm1, %v1725_v5 }
 0x36e   : > { %v1657_v0 = vpop.xlane.xlu0 %1656 }
 0x36f   : > { %v1730_v2 = vadd.f32 %v3605_v12, %v1657_v0 }
 0x370   : > { %v1660_v3 = vpop.xlane.xlu1 %1659 }
 0x371   : > { %1763 = vst.msk [vmem:[%s3609_s28 + $0x70] sm:$0xff] %vm1748_vm1, %v1730_v2  ;;  %v1731_v1 = vadd.f32 %v3605_v12, %v1660_v3 }
 0x372   : > { %v1651_v11 = vpop.xlane.xlu0 %1650 }
 0x373   : > { %1764 = vst.msk [vmem:[%s3609_s28 + $0x78] sm:$0xff] %vm1748_vm1, %v1731_v1  ;;  %v1728_v8 = vadd.f32 %v3605_v12, %v1651_v11 }
 0x374   : > { %v1654_v58 = vpop.xlane.xlu1 %1653 }
 0x375   : > { %1761 = vst.msk [vmem:[%s3609_s28 + $0x60] sm:$0xff] %vm1748_vm1, %v1728_v8  ;;  %v1729_v9 = vadd.f32 %v3605_v12, %v1654_v58 }
 0x377   : > { %1762 = vst.msk [vmem:[%s3609_s28 + $0x68] sm:$0xff] %vm1748_vm1, %v1729_v9 }
 0x37e   : > { %v1669_v27 = vpop.xlane.xlu0 %1668 }
 0x37f   : > { %v1734_v10 = vadd.f32 %v3605_v12, %v1669_v27 }
 0x380   : > { %v1672_v36 = vpop.xlane.xlu1 %1671 }
 0x381   : > { %1767 = vst.msk [vmem:[%s3609_s28 + $0x90] sm:$0xff] %vm1748_vm1, %v1734_v10  ;;  %v1735_v45 = vadd.f32 %v3605_v12, %v1672_v36 }
 0x382   : > { %v1663_v14 = vpop.xlane.xlu0 %1662 }
 0x383   : > { %1768 = vst.msk [vmem:[%s3609_s28 + $0x98] sm:$0xff] %vm1748_vm1, %v1735_v45  ;;  %v1732_v15 = vadd.f32 %v3605_v12, %v1663_v14 }
 0x384   : > { %v1666_v16 = vpop.xlane.xlu1 %1665 }
 0x385   : > { %1765 = vst.msk [vmem:[%s3609_s28 + $0x80] sm:$0xff] %vm1748_vm1, %v1732_v15  ;;  %v1733_v54 = vadd.f32 %v3605_v12, %v1666_v16 }
 0x387   : > { %1766 = vst.msk [vmem:[%s3609_s28 + $0x88] sm:$0xff] %vm1748_vm1, %v1733_v54 }
 0x38e   : > { %v1681_v52 = vpop.xlane.xlu0 %1680 }
 0x38f   : > { %v1738_v21 = vadd.f32 %v3605_v12, %v1681_v52 }
 0x390   : > { %v1684_v22 = vpop.xlane.xlu1 %1683 }
 0x391   : > { %1771 = vst.msk [vmem:[%s3609_s28 + $0xb0] sm:$0xff] %vm1748_vm1, %v1738_v21  ;;  %v1739_v23 = vadd.f32 %v3605_v12, %v1684_v22 }
 0x392   : > { %v1675_v19 = vpop.xlane.xlu0 %1674 }
 0x393   : > { %1772 = vst.msk [vmem:[%s3609_s28 + $0xb8] sm:$0xff] %vm1748_vm1, %v1739_v23  ;;  %v1736_v24 = vadd.f32 %v3605_v12, %v1675_v19 }
 0x394   : > { %v1678_v59 = vpop.xlane.xlu1 %1677 }
 0x395   : > { %1769 = vst.msk [vmem:[%s3609_s28 + $0xa0] sm:$0xff] %vm1748_vm1, %v1736_v24  ;;  %v1737_v26 = vadd.f32 %v3605_v12, %v1678_v59 }
 0x397   : > { %1770 = vst.msk [vmem:[%s3609_s28 + $0xa8] sm:$0xff] %vm1748_vm1, %v1737_v26 }
 0x39e   : > { %v1693_v28 = vpop.xlane.xlu0 %1692 }
 0x39f   : > { %v1742_v29 = vadd.f32 %v3605_v12, %v1693_v28 }
 0x3a0   : > { %v1696_v31 = vpop.xlane.xlu1 %1695 }
 0x3a1   : > { %1775 = vst.msk [vmem:[%s3609_s28 + $0xd0] sm:$0xff] %vm1748_vm1, %v1742_v29  ;;  %v1743_v13 = vadd.f32 %v3605_v12, %v1696_v31 }
 0x3a2   : > { %v1687_v33 = vpop.xlane.xlu0 %1686 }
 0x3a3   : > { %1776 = vst.msk [vmem:[%s3609_s28 + $0xd8] sm:$0xff] %vm1748_vm1, %v1743_v13  ;;  %v1740_v34 = vadd.f32 %v3605_v12, %v1687_v33 }
 0x3a4   : > { %v1690_v18 = vpop.xlane.xlu1 %1689 }
 0x3a5   : > { %1773 = vst.msk [vmem:[%s3609_s28 + $0xc0] sm:$0xff] %vm1748_vm1, %v1740_v34  ;;  %v1741_v7 = vadd.f32 %v3605_v12, %v1690_v18 }
 0x3a7   : > { %1774 = vst.msk [vmem:[%s3609_s28 + $0xc8] sm:$0xff] %vm1748_vm1, %v1741_v7 }
 0x3af   : > { %v1699_v43 = vpop.xlane.xlu0 %1698 }
 0x3b0   : > { %v1744_v37 = vadd.f32 %v3605_v12, %v1699_v43 }
 0x3b1   : > { %v1702_v38 = vpop.xlane.xlu1 %1701 }
 0x3b2   : > { %1777 = vst.msk [vmem:[%s3609_s28 + $0xe0] sm:$0xff] %vm1748_vm1, %v1744_v37  ;;  %v1745_v46 = vadd.f32 %v3605_v12, %v1702_v38  ;;  %1787 = sbr.rel (!%p3877_p5) target bundleno = 1009 (0x3f1), region = 76 }
 0x3b3   : > { %v1705_v39 = vpop.xlane.xlu0 %1704 }
 0x3b4   : > { %1778 = vst.msk [vmem:[%s3609_s28 + $0xe8] sm:$0xff] %vm1748_vm1, %v1745_v46  ;;  %v1746_v40 = vadd.f32 %v3605_v12, %v1705_v39 }
 0x3b5   : > { %v1708_v4 = vpop.xlane.xlu1 %1707 }
 0x3b6   : > { %1779 = vst.msk [vmem:[%s3609_s28 + $0xf0] sm:$0xff] %vm1748_vm1, %v1746_v40  ;;  %v1747_v41 = vadd.f32 %v3605_v12, %v1708_v4 }
 0x3b8   : > { %1780 = vst.msk [vmem:[%s3609_s28 + $0xf8] sm:$0xff] %vm1748_vm1, %v1747_v41 }
 0x3b9   : > { %s3893_s19 = smov (!%p1790_p8, %s1789_s19), 32 }
 0x3ba   : > { %s2248_s10 = sshll.u32 %s3893_s19, 7 }
 0x3bb   : > { %p2251_p11 = scmp.eq.s32.totalorder %s2248_s10, 0 }
 0x3bc   : > { %s3718_s21 = sshrl.u32 (!%p2251_p11), %s3893_s19, 5 }
 0x3bd   : > { %1798 = sbr.rel (%p2251_p11) target bundleno = 1009 (0x3f1), region = 80  ;;  %p2252_p10 = scmp.le.s32.totalorder (!%p2251_p11), %s3718_s21, 0 }
 0x3c4   : > { %2099 = sbr.rel (%p2252_p10) target bundleno = 988 (0x3dc), region = 171  ;;  %s3878_s8 = smov (!%p2252_p10), %s3712_s30 }
 0x3c5   : > { %s3879_s26 = smov (!%p2252_p10), %s3609_s28  ;;  %s3727_s22 = smov (!%p2252_p10), 0  }
 0x3c6   : > { %s3729_s23 = smov (!%p2252_p10), 0  }
 0x3cb LB: >> { %v1922_v12 = vld [vmem:[%s2947_s26] sm:$0xff]  ;;  %v1924_v42 = vld [vmem:[%s2947_s26 + $0x8] sm:$0xff]  ;;  %v1926_v20 = vld [vmem:[%s2947_s26 + $0x10] sm:$0xff]  ;;  %s1986_s14 = sadd.s32 1, %s2951_s22  ;;  %s1916_s23 = sadd.s32 1, %s2955_s23   ;;  %s2955_s23 = sphi %s3729_s23, %s1916_s23   ;;  %s2951_s22 = sphi %s3727_s22, %s3882_s22   ;;  %s2947_s26 = sphi %s3879_s26, %s3881_s26   ;;  %s2943_s8 = sphi %s3878_s8, %s3880_s8  }
 0x3cc   : >> { %1923 = vst [vmem:[%s2943_s8] sm:$0xff] %v1922_v12  ;;  %1925 = vst [vmem:[%s2943_s8 + $0x8] sm:$0xff] %v1924_v42  ;;  %v1928_v44 = vld [vmem:[%s2947_s26 + $0x18] sm:$0xff]  ;;  %v1930_v17 = vld [vmem:[%s2947_s26 + $0x20] sm:$0xff]  ;;  %p1987_p2 = scmp.ge.s32.totalorder %s1986_s14, %s3718_s21  ;;  %p1915_p3 = scmp.ge.s32.totalorder %s1916_s23, %s3718_s21 }
 0x3cd   : >> { %1927 = vst [vmem:[%s2943_s8 + $0x10] sm:$0xff] %v1926_v20  ;;  %v1932_v47 = vld [vmem:[%s2947_s26 + $0x28] sm:$0xff]  ;;  %1929 = vst [vmem:[%s2943_s8 + $0x18] sm:$0xff] %v1928_v44  ;;  %v1934_v48 = vld [vmem:[%s2947_s26 + $0x30] sm:$0xff] }
 0x3ce   : >> { %1931 = vst [vmem:[%s2943_s8 + $0x20] sm:$0xff] %v1930_v17  ;;  %1933 = vst [vmem:[%s2943_s8 + $0x28] sm:$0xff] %v1932_v47  ;;  %v1936_v51 = vld [vmem:[%s2947_s26 + $0x38] sm:$0xff]  ;;  %v1938_v49 = vld [vmem:[%s2947_s26 + $0x40] sm:$0xff]  ;;  %s3895_s14 = smov (%p1987_p2, %s1986_s14), 0 }
 0x3cf   : >> { %1935 = vst [vmem:[%s2943_s8 + $0x30] sm:$0xff] %v1934_v48  ;;  %1937 = vst [vmem:[%s2943_s8 + $0x38] sm:$0xff] %v1936_v51  ;;  %v1940_v50 = vld [vmem:[%s2947_s26 + $0x48] sm:$0xff]  ;;  %v1942_v57 = vld [vmem:[%s2947_s26 + $0x50] sm:$0xff]  ;;  %s2253_s20 = sshll.u32 %s3895_s14, 8  ;;  %s3882_s22 = smov %s3895_s14 }
 0x3d0   : >> { %1939 = vst [vmem:[%s2943_s8 + $0x40] sm:$0xff] %v1938_v49  ;;  %v1944_v25 = vld [vmem:[%s2947_s26 + $0x58] sm:$0xff]  ;;  %1941 = vst [vmem:[%s2943_s8 + $0x48] sm:$0xff] %v1940_v50  ;;  %v1946_v53 = vld [vmem:[%s2947_s26 + $0x60] sm:$0xff]  ;;  %s3785_s15 = scalar_lea.vmem %s3609_s28, %s2253_s20 [#allocation10]   ;;  %s1992_s18 = scalar_lea.vmem %s3712_s30, %s2253_s20  }
 0x3d1   : >> { %1943 = vst [vmem:[%s2943_s8 + $0x50] sm:$0xff] %v1942_v57  ;;  %1945 = vst [vmem:[%s2943_s8 + $0x58] sm:$0xff] %v1944_v25  ;;  %v1948_v55 = vld [vmem:[%s2947_s26 + $0x68] sm:$0xff]  ;;  %v1950_v56 = vld [vmem:[%s2947_s26 + $0x70] sm:$0xff] }
 0x3d2   : >> { %1947 = vst [vmem:[%s2943_s8 + $0x60] sm:$0xff] %v1946_v53  ;;  %1949 = vst [vmem:[%s2943_s8 + $0x68] sm:$0xff] %v1948_v55  ;;  %v1952_v35 = vld [vmem:[%s2947_s26 + $0x78] sm:$0xff]  ;;  %v1954_v32 = vld [vmem:[%s2947_s26 + $0x80] sm:$0xff] }
 0x3d3   : >> { %1951 = vst [vmem:[%s2943_s8 + $0x70] sm:$0xff] %v1950_v56  ;;  %v1956_v30 = vld [vmem:[%s2947_s26 + $0x88] sm:$0xff]  ;;  %1953 = vst [vmem:[%s2943_s8 + $0x78] sm:$0xff] %v1952_v35  ;;  %v1958_v6 = vld [vmem:[%s2947_s26 + $0x90] sm:$0xff] }
 0x3d4   : >> { %1955 = vst [vmem:[%s2943_s8 + $0x80] sm:$0xff] %v1954_v32  ;;  %1957 = vst [vmem:[%s2943_s8 + $0x88] sm:$0xff] %v1956_v30  ;;  %v1960_v60 = vld [vmem:[%s2947_s26 + $0x98] sm:$0xff]  ;;  %v1962_v63 = vld [vmem:[%s2947_s26 + $0xa0] sm:$0xff] }
 0x3d5   : >> { %1959 = vst [vmem:[%s2943_s8 + $0x90] sm:$0xff] %v1958_v6  ;;  %1961 = vst [vmem:[%s2943_s8 + $0x98] sm:$0xff] %v1960_v60  ;;  %v1964_v61 = vld [vmem:[%s2947_s26 + $0xa8] sm:$0xff]  ;;  %v1966_v62 = vld [vmem:[%s2947_s26 + $0xb0] sm:$0xff]  ;;  %1918 = sbr.rel (!%p1915_p3) target bundleno = 971 (0x3cb), region = 177 }
 0x3d6   : >> { %1963 = vst [vmem:[%s2943_s8 + $0xa0] sm:$0xff] %v1962_v63  ;;  %v1968_v5 = vld [vmem:[%s2947_s26 + $0xb8] sm:$0xff]  ;;  %1965 = vst [vmem:[%s2943_s8 + $0xa8] sm:$0xff] %v1964_v61  ;;  %v1970_v0 = vld [vmem:[%s2947_s26 + $0xc0] sm:$0xff] }
 0x3d7   : >> { %1967 = vst [vmem:[%s2943_s8 + $0xb0] sm:$0xff] %v1966_v62  ;;  %1969 = vst [vmem:[%s2943_s8 + $0xb8] sm:$0xff] %v1968_v5  ;;  %v1972_v2 = vld [vmem:[%s2947_s26 + $0xc8] sm:$0xff]  ;;  %v1974_v3 = vld [vmem:[%s2947_s26 + $0xd0] sm:$0xff] }
 0x3d8   : >> { %1971 = vst [vmem:[%s2943_s8 + $0xc0] sm:$0xff] %v1970_v0  ;;  %1973 = vst [vmem:[%s2943_s8 + $0xc8] sm:$0xff] %v1972_v2  ;;  %v1976_v1 = vld [vmem:[%s2947_s26 + $0xd8] sm:$0xff]  ;;  %v1978_v11 = vld [vmem:[%s2947_s26 + $0xe0] sm:$0xff] }
 0x3d9   : >> { %1975 = vst [vmem:[%s2943_s8 + $0xd0] sm:$0xff] %v1974_v3  ;;  %v1980_v8 = vld [vmem:[%s2947_s26 + $0xe8] sm:$0xff]  ;;  %1977 = vst [vmem:[%s2943_s8 + $0xd8] sm:$0xff] %v1976_v1  ;;  %v1982_v58 = vld [vmem:[%s2947_s26 + $0xf0] sm:$0xff] }
 0x3da   : >> { %1979 = vst [vmem:[%s2943_s8 + $0xe0] sm:$0xff] %v1978_v11  ;;  %1981 = vst [vmem:[%s2943_s8 + $0xe8] sm:$0xff] %v1980_v8  ;;  %v1984_v9 = vld [vmem:[%s2947_s26 + $0xf8] sm:$0xff]  ;;  %s3881_s26 = smov %s3785_s15 }
 0x3db   : >> { %1983 = vst [vmem:[%s2943_s8 + $0xf0] sm:$0xff] %v1982_v58  ;;  %1985 = vst [vmem:[%s2943_s8 + $0xf8] sm:$0xff] %v1984_v9  ;;  %s3880_s8 = smov %s1992_s18 }
 0x3dc PF: > { %s3826_s11 = sand.u32 31, %s3893_s19   ;;  %s2270_s16 = sshll.u32 %s3718_s21, 8 }
 0x3dd   : > { %s1997_s27 = scalar_lea.vmem %s3609_s28, %s2270_s16 [#allocation10]   ;;  %s1999_s29 = scalar_lea.vmem %s3712_s30, %s2270_s16  }
 0x3de   : > { %p2258_p6 = scmp.le.s32.totalorder %s3826_s11, 0 }
 0x3df   : > { %s2957_s25 = smov (!%p2258_p6), %s1999_s29   ;;  %s2961_s17 = smov (!%p2258_p6), %s1997_s27  }
 0x3e0   : > { %2113 = sbr.rel (%p2258_p6) target bundleno = 1009 (0x3f1), region = 182  ;;  %s2965_s24 = smov (!%p2258_p6), 0  }
 0x3e1   : > { %s2969_s10 = smov (!%p2258_p6), 0  }
 0x3e7 LB: >> { %v2009_v27 = vld [vmem:[%s2963_s17] sm:$0xff]  ;;  %s2011_s19 = sadd.s32 1, %s2967_s24  ;;  %s2003_s10 = sadd.s32 1, %s2971_s10   ;;  %s2971_s10 = sphi %s2969_s10, %s2003_s10   ;;  %s2967_s24 = sphi %s2965_s24, %s2966_s24   ;;  %s2963_s17 = sphi %s2961_s17, %s2016_s17   ;;  %s2959_s25 = sphi %s2957_s25, %s2017_s25  }
 0x3e8   : >> { %2010 = vst [vmem:[%s2959_s25] sm:$0xff] %v2009_v27  ;;  %p2012_p9 = scmp.ge.s32.totalorder %s2011_s19, %s3826_s11  ;;  %p2002_p7 = scmp.ge.s32.totalorder %s2003_s10, %s3826_s11 }
 0x3ea   : >> { %s3897_s19 = smov (%p2012_p9, %s2011_s19), 0  ;;  %2005 = sbr.rel (!%p2002_p7) target bundleno = 999 (0x3e7), region = 188 }
 0x3eb   : >> { %s2259_s28 = sshll.u32 %s3897_s19, 3  ;;  %s2966_s24 = smov %s3897_s19  }
 0x3ec   : >> { %s2016_s17 = scalar_lea.vmem %s1997_s27, %s2259_s28 [#allocation10]   ;;  %s2017_s25 = scalar_lea.vmem %s1999_s29, %s2259_s28  }
 0x3f1 PF: > { %s3883_s14 = sld [smem:[#allocation15_spill]]  ;;  %s3884_s30 = sld [smem:[#allocation16_spill]] }
 0x3f2   : > { %s3885_s11 = smov %s2931_s12  ;;  %s3886_s12 = smov %s2935_s13 }
 0x3f7   : > { %p25_p12 = scmp.ge.s32.totalorder %s3883_s14, 4   ;;  %s3887_s13 = smov %s3884_s30 }
 0x3f9   :  { %27 = sbr.rel (!%p25_p12) target bundleno = 9 (0x9), region = 199 }
 0x400   :  { %2033 = vsyncpa [#allocation4], 1 }
 0x401   :  { %2035 = vsyncpa [#allocation4 + $0x1], 1 }
 0x402   :  { %2036 = vsyncpa [#allocation6], 1 }
 0x403   :  { %2038 = vsyncpa [#allocation6 + $0x1], 1 }
 0x404   :  { %2039 = vsyncpa [#allocation9], 1 }

</bundles_post_ra>
